<compile_context>
chip_gen: v7x
topology: tpu7x:2x2x1
jax: 0.10.0
libtpu: 0.0.40
codegen_flags: <defaults>
</compile_context>

<pallas_src>
import math
import functools

import jax
import jax.numpy as jnp
from jax.experimental import pallas as pl
from jax.experimental.pallas import tpu as pltpu


def qkv_ps_kernel(cls_ref, wq_ref, bias_ref, gamma_ref, beta_ref,
                  pk_big_ref, pv_ref, out_ref, *, k, pool, eps, fuse_mix):
    """One batch tile: LayerNorm -> Q proj -> per-head softmax -> prompt mix."""
    # ---- LayerNorm over d_model (f32 VPU math; rsqrt maps to the EUP) ----
    x = cls_ref[...].astype(jnp.float32)                                 # (TB, D)
    mean = jnp.mean(x, axis=-1, keepdims=True)
    var = jnp.mean(jnp.square(x - mean), axis=-1, keepdims=True)
    xn = (x - mean) * jax.lax.rsqrt(var + eps)
    xn = xn * gamma_ref[...].astype(jnp.float32) + beta_ref[...].astype(jnp.float32)

    # ---- Q projection: bf16 operands on the MXU, f32 accumulation ----
    q = jnp.dot(xn.astype(jnp.bfloat16), wq_ref[...],
                preferred_element_type=jnp.float32)                      # (TB, D)
    q = q + bias_ref[...].astype(jnp.float32)

    # ---- similarity for ALL heads in one lane-dense bf16 matmul ----
    # pk_big is block-diagonal (D, k*pool), pre-scaled by 1/sqrt(d_model):
    # column block h only sees head h's columns of q, so
    # sim[:, h*pool:(h+1)*pool] == q_h @ prompts_K^T / sqrt(D).
    sim = jnp.dot(q.astype(jnp.bfloat16), pk_big_ref[...],
                  preferred_element_type=jnp.float32)                    # (TB, k*pool)

    # ---- per-head softmax on static lane slices (VPU/XLU/EUP work) ----
    a_heads = []
    for h in range(k):
        s_h = sim[:, h * pool:(h + 1) * pool]                            # (TB, pool)
        s_h = s_h - jnp.max(s_h, axis=-1, keepdims=True)
        e = jnp.exp(s_h)
        a_h = e * pl.reciprocal(jnp.sum(e, axis=-1, keepdims=True), approx=True)
        a_heads.append(a_h)
    # Dropout(p=0.1) on A: identity in eval mode (see TODO at top of file).

    if fuse_mix:
        # One block-diagonal mixing matmul writes the whole (TB, k*D) slab.
        a_all = jnp.concatenate(a_heads, axis=-1).astype(jnp.bfloat16)   # (TB, k*pool)
        sel = jnp.dot(a_all, pv_ref[...],
                      preferred_element_type=jnp.float32)                # (TB, k*D)
        out_ref[...] = sel.astype(out_ref.dtype)      # single lane-dense store
    else:
        # k*pool too large for the fused block-diagonal trick: per-head bf16
        # mixing matmuls, each stored to a lane-dense D-wide slice.
        pv = pv_ref[...]                                                 # (pool, D) bf16
        d = pv.shape[-1]
        for h in range(k):
            sel_h = jnp.dot(a_heads[h].astype(jnp.bfloat16), pv,
                            preferred_element_type=jnp.float32)          # (TB, D)
            out_ref[:, h * d:(h + 1) * d] = sel_h.astype(out_ref.dtype)


def _pick_batch_tile(batch, max_tile=128, min_steps=2):
    """Batch tile: sublane-aligned (multiple of 8), capped at max_tile, and small
    enough to give >= min_steps grid steps (keeps both v7x TensorCores busy via
    dimension_semantics=("parallel",)).  Tiny batches use one full, always-legal
    block.  (On v6e's 128 MiB VMEM, max_tile=256 is a reasonable bump.)"""
    if batch < 16:
        return batch
    t = min(max_tile, max(8, batch // min_steps))
    return max(8, t - (t % 8))


def qkv_ps_forward(cls, w_q, bias_q, gamma, beta, prompts_k, prompts_v,
                   *, k, fixed_prompts=None, eps=1e-5, batch_tile=128,
                   out_dtype=None, single_buffer_residents=True):
    """Pallas-backed forward of QKV_ps. Returns (B, [n_fixed +] k, D)."""
    B, D = cls.shape
    assert D % k == 0
    pool = prompts_k.shape[0]
    out_dtype = cls.dtype if out_dtype is None else out_dtype

    # Fused block-diagonal mixing only pays off while k*pool fits one MXU pass.
    fuse_mix = (k * pool) <= 128

    # One-time layout / precision plumbing (const-folded with the parameters):
    #  * W_Q, pk_big, PV as bf16: single-pass MXU feeds, half the HBM/VMEM bytes.
    #  * pk_big = block-diag(prompts_K^T) pre-scaled by 1/sqrt(d_model).
    #  * PV_big = block-diag(prompts_V) so the mixing is one matmul (fused path).
    w_q_bf16 = w_q.astype(jnp.bfloat16)
    eye_k = jnp.eye(k, dtype=jnp.float32)
    pk_big = jnp.kron(eye_k, prompts_k.T.astype(jnp.float32)
                      * (1.0 / math.sqrt(D))).astype(jnp.bfloat16)       # (D, k*pool)
    if fuse_mix:
        pv_op = jnp.kron(eye_k, prompts_v.astype(jnp.float32)).astype(jnp.bfloat16)
    else:
        pv_op = prompts_v.astype(jnp.bfloat16)                           # (pool, D)

    tile_b = _pick_batch_tile(B, batch_tile)
    num_tiles = -(-B // tile_b)
    B_pad = num_tiles * tile_b
    cls_in = cls if B_pad == B else jnp.pad(cls, ((0, B_pad - B), (0, 0)))

    # VMEM budget: residents (assume worst-case double buffering) + streamed
    # CLS/out tiles (double-buffered), 25% headroom, clipped to [32, 100] MiB.
    out_itemsize = jnp.dtype(out_dtype).itemsize
    resident_bytes = (2 * D * D                      # W_Q bf16
                      + 2 * D * k * pool             # pk_big bf16
                      + 2 * pv_op.shape[0] * pv_op.shape[1]
                      + 3 * 4 * D)                   # bias / gamma / beta f32
    streamed_bytes = 4 * tile_b * D + out_itemsize * tile_b * k * D
    vmem_limit = int(1.25 * (2 * resident_bytes + 2 * streamed_bytes)) + (4 << 20)
    vmem_limit = max(32 << 20, min(vmem_limit, 100 << 20))

    kern = functools.partial(qkv_ps_kernel, k=k, pool=pool, eps=eps,
                             fuse_mix=fuse_mix)

    def _call(single_buffer):
        const2 = lambda i: (0, 0)
        if single_buffer:
            # Resident operands don't need double buffering: single-buffer them.
            res_spec = lambda s: pl.BlockSpec(s, const2, pipeline_mode=pl.Buffered(1))
        else:
            res_spec = lambda s: pl.BlockSpec(s, const2)
        out = pl.pallas_call(
            kern,
            out_shape=jax.ShapeDtypeStruct((B_pad, k * D), out_dtype),
            grid=(num_tiles,),
            in_specs=[
                pl.BlockSpec((tile_b, D), lambda i: (i, 0)),  # CLS (streamed, pipelined)
                res_spec((D, D)),                             # W_Q (bf16, resident)
                res_spec((1, D)),                             # bias_Q
                res_spec((1, D)),                             # LayerNorm gamma
                res_spec((1, D)),                             # LayerNorm beta
                res_spec((D, k * pool)),                      # block-diag prompts_K^T (bf16)
                res_spec(pv_op.shape),                        # prompts_V / block-diag PV (bf16)
            ],
            out_specs=pl.BlockSpec((tile_b, k * D), lambda i: (i, 0)),
            compiler_params=pltpu.CompilerParams(
                dimension_semantics=("parallel",),            # shard batch tiles across TCs
                vmem_limit_bytes=vmem_limit,                  # explicit (v5e default is 16 MiB)
            ),
        )(cls_in, w_q_bf16, bias_q.reshape(1, D), gamma.reshape(1, D),
          beta.reshape(1, D), pk_big, pv_op)
        return jax.block_until_ready(out)

    if single_buffer_residents:
        try:
            sel_flat = _call(True)
        except Exception:
            # pipeline_mode=pl.Buffered(1) not supported by this Pallas build:
            # fall back to default (double) buffering; vmem_limit still applies.
            sel_flat = _call(False)
    else:
        sel_flat = _call(False)

    # (B_pad, k*D) -> (B, k, D): drop padding rows + free reshape (no HBM transpose).
    selected = sel_flat[:B].reshape(B, k, D)

    if fixed_prompts is not None:
        fp = jnp.broadcast_to(fixed_prompts[None, :, :].astype(selected.dtype),
                              (B,) + fixed_prompts.shape)
        selected = jnp.concatenate([fp, selected], axis=1)
    return selected


def qkv_ps_reference(cls, w_q, bias_q, gamma, beta, prompts_k, prompts_v,
                     *, k, fixed_prompts=None, eps=1e-5):
    """Pure-f32 JAX reference matching the PyTorch forward (eval mode)."""
    B, D = cls.shape
    x = cls.astype(jnp.float32)
    mean = jnp.mean(x, axis=-1, keepdims=True)
    var = jnp.mean((x - mean) ** 2, axis=-1, keepdims=True)
    xn = (x - mean) / jnp.sqrt(var + eps) * gamma + beta
    q = xn @ w_q + bias_q
    q = q.reshape(B, k, D // k)
    sim = jnp.einsum('bkd,pd->bkp', q, prompts_k) / math.sqrt(D)
    a = jax.nn.softmax(sim, axis=-1)
    sel = jnp.einsum('bkp,pd->bkd', a, prompts_v)
    if fixed_prompts is not None:
        fp = jnp.broadcast_to(fixed_prompts[None, :, :], (B,) + fixed_prompts.shape)
        sel = jnp.concatenate([fp, sel], axis=1)
    return sel.astype(cls.dtype)


if __name__ == "__main__":
    # Small, module-consistent shapes: d_model % k == 0 (d_head = 2, k*pool = 128).
    B, D, K, POOL = 2, 32, 16, 8
    D_HEAD = D // K

    key = jax.random.PRNGKey(0)
    k_cls, k_wq, k_bq, k_pk, k_pv = jax.random.split(key, 5)

    cls = jax.random.normal(k_cls, (B, D), dtype=jnp.float32)

    # Parameters (deterministic init; W_Q / bias_Q are torch.empty in the module,
    # so any deterministic values are acceptable here).
    w_q = jax.random.normal(k_wq, (D, D), dtype=jnp.float32) * (1.0 / math.sqrt(D))
    bias_q = jax.random.normal(k_bq, (D,), dtype=jnp.float32) * 0.02
    # kaiming_normal_(fan_in, relu): std = sqrt(2 / fan_in)
    prompts_k = jax.random.normal(k_pk, (POOL, D_HEAD), dtype=jnp.float32) * math.sqrt(2.0 / D_HEAD)
    prompts_v = jax.random.normal(k_pv, (POOL, D), dtype=jnp.float32) * math.sqrt(2.0 / D)
    gamma = jnp.ones((D,), dtype=jnp.float32)   # LayerNorm weight
    beta = jnp.zeros((D,), dtype=jnp.float32)   # LayerNorm bias
    fixed_prompts = None                        # fixed_prompts=0 (module default)

    out = qkv_ps_forward(cls, w_q, bias_q, gamma, beta, prompts_k, prompts_v,
                         k=K, fixed_prompts=fixed_prompts)
    out = jax.block_until_ready(out)

    ref = qkv_ps_reference(cls, w_q, bias_q, gamma, beta, prompts_k, prompts_v,
                           k=K, fixed_prompts=fixed_prompts)

    assert out.shape == (B, K, D), out.shape
    max_err = float(jnp.max(jnp.abs(out.astype(jnp.float32) - ref.astype(jnp.float32))))
    # bf16 MXU feeds + approx reciprocal vs. pure-f32 reference: 2e-2 tolerance.
    assert jnp.allclose(out, ref, atol=2e-2, rtol=2e-2), max_err
    print("KERNEL_OK")
</pallas_src>

<mosaic_0001>
module attributes {stable_mosaic.version = 11 : i64} {
  func.func @qkv_ps_kernel(%arg0: i32, %arg1: memref<2x32xf32, #tpu.memory_space<vmem>>, %arg2: memref<32x32xbf16, #tpu.memory_space<vmem>>, %arg3: memref<1x32xf32, #tpu.memory_space<vmem>>, %arg4: memref<1x32xf32, #tpu.memory_space<vmem>>, %arg5: memref<1x32xf32, #tpu.memory_space<vmem>>, %arg6: memref<32x128xbf16, #tpu.memory_space<vmem>>, %arg7: memref<128x512xbf16, #tpu.memory_space<vmem>>, %arg8: memref<2x512xf32, #tpu.memory_space<vmem>>) attributes {dimension_semantics = [#tpu.dimension_semantics<parallel>], iteration_bounds = array<i64: 1>, scalar_prefetch = 0 : i64, scratch_operands = 0 : i64, tpu.core_type = #tpu.core_type<tc>, window_params = [{transform_indices = @transform_0, window_bounds = array<i64: 2, 32>}, {pipeline_mode = #tpu.pipeline_mode<synchronous>, transform_indices = @transform_1, window_bounds = array<i64: 32, 32>}, {pipeline_mode = #tpu.pipeline_mode<synchronous>, transform_indices = @transform_2, window_bounds = array<i64: 1, 32>}, {pipeline_mode = #tpu.pipeline_mode<synchronous>, transform_indices = @transform_3, window_bounds = array<i64: 1, 32>}, {pipeline_mode = #tpu.pipeline_mode<synchronous>, transform_indices = @transform_4, window_bounds = array<i64: 1, 32>}, {pipeline_mode = #tpu.pipeline_mode<synchronous>, transform_indices = @transform_5, window_bounds = array<i64: 32, 128>}, {pipeline_mode = #tpu.pipeline_mode<synchronous>, transform_indices = @transform_6, window_bounds = array<i64: 128, 512>}, {transform_indices = @transform_7, window_bounds = array<i64: 2, 512>}]} {
    %c0 = arith.constant 0 : index
    %c0_0 = arith.constant 0 : index
    %0 = vector.load %arg1[%c0, %c0_0] : memref<2x32xf32, #tpu.memory_space<vmem>>, vector<2x32xf32>
    %cst = arith.constant dense<0.000000e+00> : vector<2xf32>
    %1 = vector.multi_reduction <add>, %0, %cst [1] : vector<2x32xf32> to vector<2xf32>
    %2 = vector.shape_cast %1 : vector<2xf32> to vector<2x1xf32>
    %cst_1 = arith.constant 3.200000e+01 : f32
    %3 = vector.broadcast %cst_1 : f32 to vector<2x1xf32>
    %4 = arith.divf %2, %3 : vector<2x1xf32>
    %5 = vector.broadcast %4 : vector<2x1xf32> to vector<2x32xf32>
    %6 = arith.subf %0, %5 : vector<2x32xf32>
    %7 = arith.mulf %6, %6 : vector<2x32xf32>
    %cst_2 = arith.constant dense<0.000000e+00> : vector<2xf32>
    %8 = vector.multi_reduction <add>, %7, %cst_2 [1] : vector<2x32xf32> to vector<2xf32>
    %9 = vector.shape_cast %8 : vector<2xf32> to vector<2x1xf32>
    %cst_3 = arith.constant 3.200000e+01 : f32
    %10 = vector.broadcast %cst_3 : f32 to vector<2x1xf32>
    %11 = arith.divf %9, %10 : vector<2x1xf32>
    %12 = vector.broadcast %4 : vector<2x1xf32> to vector<2x32xf32>
    %13 = arith.subf %0, %12 : vector<2x32xf32>
    %cst_4 = arith.constant 9.99999974E-6 : f32
    %14 = vector.broadcast %cst_4 : f32 to vector<2x1xf32>
    %15 = arith.addf %11, %14 : vector<2x1xf32>
    %16 = math.rsqrt %15 : vector<2x1xf32>
    %17 = vector.broadcast %16 : vector<2x1xf32> to vector<2x32xf32>
    %18 = arith.mulf %13, %17 : vector<2x32xf32>
    %c0_5 = arith.constant 0 : index
    %c0_6 = arith.constant 0 : index
    %19 = vector.load %arg4[%c0_5, %c0_6] : memref<1x32xf32, #tpu.memory_space<vmem>>, vector<1x32xf32>
    %20 = vector.broadcast %19 : vector<1x32xf32> to vector<2x32xf32>
    %21 = arith.mulf %18, %20 : vector<2x32xf32>
    %c0_7 = arith.constant 0 : index
    %c0_8 = arith.constant 0 : index
    %22 = vector.load %arg5[%c0_7, %c0_8] : memref<1x32xf32, #tpu.memory_space<vmem>>, vector<1x32xf32>
    %23 = vector.broadcast %22 : vector<1x32xf32> to vector<2x32xf32>
    %24 = arith.addf %21, %23 : vector<2x32xf32>
    %25 = arith.truncf %24 : vector<2x32xf32> to vector<2x32xbf16>
    %c0_9 = arith.constant 0 : index
    %c0_10 = arith.constant 0 : index
    %26 = vector.load %arg2[%c0_9, %c0_10] : memref<32x32xbf16, #tpu.memory_space<vmem>>, vector<32x32xbf16>
    %cst_11 = arith.constant dense<0.000000e+00> : vector<2x32xf32>
    %27 = tpu.matmul %25, %26, %cst_11 {dimension_numbers = #tpu.dot_dimension_numbers<[1], [0], [0], [1], [0, 0, 1, 1], [], []>} : vector<2x32xbf16>, vector<32x32xbf16>, vector<2x32xf32> -> vector<2x32xf32>
    %c0_12 = arith.constant 0 : index
    %c0_13 = arith.constant 0 : index
    %28 = vector.load %arg3[%c0_12, %c0_13] : memref<1x32xf32, #tpu.memory_space<vmem>>, vector<1x32xf32>
    %29 = vector.broadcast %28 : vector<1x32xf32> to vector<2x32xf32>
    %30 = arith.addf %27, %29 : vector<2x32xf32>
    %31 = arith.truncf %30 : vector<2x32xf32> to vector<2x32xbf16>
    %c0_14 = arith.constant 0 : index
    %c0_15 = arith.constant 0 : index
    %32 = vector.load %arg6[%c0_14, %c0_15] : memref<32x128xbf16, #tpu.memory_space<vmem>>, vector<32x128xbf16>
    %cst_16 = arith.constant dense<0.000000e+00> : vector<2x128xf32>
    %33 = tpu.matmul %31, %32, %cst_16 {dimension_numbers = #tpu.dot_dimension_numbers<[1], [0], [0], [1], [0, 0, 1, 1], [], []>} : vector<2x32xbf16>, vector<32x128xbf16>, vector<2x128xf32> -> vector<2x128xf32>
    %34 = vector.extract_strided_slice %33 {offsets = [0, 0], sizes = [2, 8], strides = [1, 1]} : vector<2x128xf32> to vector<2x8xf32>
    %cst_17 = arith.constant dense<0xFF800000> : vector<2xf32>
    %35 = vector.multi_reduction <maximumf>, %34, %cst_17 [1] : vector<2x8xf32> to vector<2xf32>
    %36 = vector.shape_cast %35 : vector<2xf32> to vector<2x1xf32>
    %37 = vector.broadcast %36 : vector<2x1xf32> to vector<2x8xf32>
    %38 = arith.subf %34, %37 : vector<2x8xf32>
    %39 = math.exp %38 : vector<2x8xf32>
    %cst_18 = arith.constant dense<0.000000e+00> : vector<2xf32>
    %40 = vector.multi_reduction <add>, %39, %cst_18 [1] : vector<2x8xf32> to vector<2xf32>
    %41 = vector.shape_cast %40 : vector<2xf32> to vector<2x1xf32>
    %42 = tpu.reciprocal %41 {approx = true} : vector<2x1xf32> -> vector<2x1xf32>
    %43 = vector.broadcast %42 : vector<2x1xf32> to vector<2x8xf32>
    %44 = arith.mulf %39, %43 : vector<2x8xf32>
    %45 = vector.extract_strided_slice %33 {offsets = [0, 8], sizes = [2, 8], strides = [1, 1]} : vector<2x128xf32> to vector<2x8xf32>
    %cst_19 = arith.constant dense<0xFF800000> : vector<2xf32>
    %46 = vector.multi_reduction <maximumf>, %45, %cst_19 [1] : vector<2x8xf32> to vector<2xf32>
    %47 = vector.shape_cast %46 : vector<2xf32> to vector<2x1xf32>
    %48 = vector.broadcast %47 : vector<2x1xf32> to vector<2x8xf32>
    %49 = arith.subf %45, %48 : vector<2x8xf32>
    %50 = math.exp %49 : vector<2x8xf32>
    %cst_20 = arith.constant dense<0.000000e+00> : vector<2xf32>
    %51 = vector.multi_reduction <add>, %50, %cst_20 [1] : vector<2x8xf32> to vector<2xf32>
    %52 = vector.shape_cast %51 : vector<2xf32> to vector<2x1xf32>
    %53 = tpu.reciprocal %52 {approx = true} : vector<2x1xf32> -> vector<2x1xf32>
    %54 = vector.broadcast %53 : vector<2x1xf32> to vector<2x8xf32>
    %55 = arith.mulf %50, %54 : vector<2x8xf32>
    %56 = vector.extract_strided_slice %33 {offsets = [0, 16], sizes = [2, 8], strides = [1, 1]} : vector<2x128xf32> to vector<2x8xf32>
    %cst_21 = arith.constant dense<0xFF800000> : vector<2xf32>
    %57 = vector.multi_reduction <maximumf>, %56, %cst_21 [1] : vector<2x8xf32> to vector<2xf32>
    %58 = vector.shape_cast %57 : vector<2xf32> to vector<2x1xf32>
    %59 = vector.broadcast %58 : vector<2x1xf32> to vector<2x8xf32>
    %60 = arith.subf %56, %59 : vector<2x8xf32>
    %61 = math.exp %60 : vector<2x8xf32>
    %cst_22 = arith.constant dense<0.000000e+00> : vector<2xf32>
    %62 = vector.multi_reduction <add>, %61, %cst_22 [1] : vector<2x8xf32> to vector<2xf32>
    %63 = vector.shape_cast %62 : vector<2xf32> to vector<2x1xf32>
    %64 = tpu.reciprocal %63 {approx = true} : vector<2x1xf32> -> vector<2x1xf32>
    %65 = vector.broadcast %64 : vector<2x1xf32> to vector<2x8xf32>
    %66 = arith.mulf %61, %65 : vector<2x8xf32>
    %67 = vector.extract_strided_slice %33 {offsets = [0, 24], sizes = [2, 8], strides = [1, 1]} : vector<2x128xf32> to vector<2x8xf32>
    %cst_23 = arith.constant dense<0xFF800000> : vector<2xf32>
    %68 = vector.multi_reduction <maximumf>, %67, %cst_23 [1] : vector<2x8xf32> to vector<2xf32>
    %69 = vector.shape_cast %68 : vector<2xf32> to vector<2x1xf32>
    %70 = vector.broadcast %69 : vector<2x1xf32> to vector<2x8xf32>
    %71 = arith.subf %67, %70 : vector<2x8xf32>
    %72 = math.exp %71 : vector<2x8xf32>
    %cst_24 = arith.constant dense<0.000000e+00> : vector<2xf32>
    %73 = vector.multi_reduction <add>, %72, %cst_24 [1] : vector<2x8xf32> to vector<2xf32>
    %74 = vector.shape_cast %73 : vector<2xf32> to vector<2x1xf32>
    %75 = tpu.reciprocal %74 {approx = true} : vector<2x1xf32> -> vector<2x1xf32>
    %76 = vector.broadcast %75 : vector<2x1xf32> to vector<2x8xf32>
    %77 = arith.mulf %72, %76 : vector<2x8xf32>
    %78 = vector.extract_strided_slice %33 {offsets = [0, 32], sizes = [2, 8], strides = [1, 1]} : vector<2x128xf32> to vector<2x8xf32>
    %cst_25 = arith.constant dense<0xFF800000> : vector<2xf32>
    %79 = vector.multi_reduction <maximumf>, %78, %cst_25 [1] : vector<2x8xf32> to vector<2xf32>
    %80 = vector.shape_cast %79 : vector<2xf32> to vector<2x1xf32>
    %81 = vector.broadcast %80 : vector<2x1xf32> to vector<2x8xf32>
    %82 = arith.subf %78, %81 : vector<2x8xf32>
    %83 = math.exp %82 : vector<2x8xf32>
    %cst_26 = arith.constant dense<0.000000e+00> : vector<2xf32>
    %84 = vector.multi_reduction <add>, %83, %cst_26 [1] : vector<2x8xf32> to vector<2xf32>
    %85 = vector.shape_cast %84 : vector<2xf32> to vector<2x1xf32>
    %86 = tpu.reciprocal %85 {approx = true} : vector<2x1xf32> -> vector<2x1xf32>
    %87 = vector.broadcast %86 : vector<2x1xf32> to vector<2x8xf32>
    %88 = arith.mulf %83, %87 : vector<2x8xf32>
    %89 = vector.extract_strided_slice %33 {offsets = [0, 40], sizes = [2, 8], strides = [1, 1]} : vector<2x128xf32> to vector<2x8xf32>
    %cst_27 = arith.constant dense<0xFF800000> : vector<2xf32>
    %90 = vector.multi_reduction <maximumf>, %89, %cst_27 [1] : vector<2x8xf32> to vector<2xf32>
    %91 = vector.shape_cast %90 : vector<2xf32> to vector<2x1xf32>
    %92 = vector.broadcast %91 : vector<2x1xf32> to vector<2x8xf32>
    %93 = arith.subf %89, %92 : vector<2x8xf32>
    %94 = math.exp %93 : vector<2x8xf32>
    %cst_28 = arith.constant dense<0.000000e+00> : vector<2xf32>
    %95 = vector.multi_reduction <add>, %94, %cst_28 [1] : vector<2x8xf32> to vector<2xf32>
    %96 = vector.shape_cast %95 : vector<2xf32> to vector<2x1xf32>
    %97 = tpu.reciprocal %96 {approx = true} : vector<2x1xf32> -> vector<2x1xf32>
    %98 = vector.broadcast %97 : vector<2x1xf32> to vector<2x8xf32>
    %99 = arith.mulf %94, %98 : vector<2x8xf32>
    %100 = vector.extract_strided_slice %33 {offsets = [0, 48], sizes = [2, 8], strides = [1, 1]} : vector<2x128xf32> to vector<2x8xf32>
    %cst_29 = arith.constant dense<0xFF800000> : vector<2xf32>
    %101 = vector.multi_reduction <maximumf>, %100, %cst_29 [1] : vector<2x8xf32> to vector<2xf32>
    %102 = vector.shape_cast %101 : vector<2xf32> to vector<2x1xf32>
    %103 = vector.broadcast %102 : vector<2x1xf32> to vector<2x8xf32>
    %104 = arith.subf %100, %103 : vector<2x8xf32>
    %105 = math.exp %104 : vector<2x8xf32>
    %cst_30 = arith.constant dense<0.000000e+00> : vector<2xf32>
    %106 = vector.multi_reduction <add>, %105, %cst_30 [1] : vector<2x8xf32> to vector<2xf32>
    %107 = vector.shape_cast %106 : vector<2xf32> to vector<2x1xf32>
    %108 = tpu.reciprocal %107 {approx = true} : vector<2x1xf32> -> vector<2x1xf32>
    %109 = vector.broadcast %108 : vector<2x1xf32> to vector<2x8xf32>
    %110 = arith.mulf %105, %109 : vector<2x8xf32>
    %111 = vector.extract_strided_slice %33 {offsets = [0, 56], sizes = [2, 8], strides = [1, 1]} : vector<2x128xf32> to vector<2x8xf32>
    %cst_31 = arith.constant dense<0xFF800000> : vector<2xf32>
    %112 = vector.multi_reduction <maximumf>, %111, %cst_31 [1] : vector<2x8xf32> to vector<2xf32>
    %113 = vector.shape_cast %112 : vector<2xf32> to vector<2x1xf32>
    %114 = vector.broadcast %113 : vector<2x1xf32> to vector<2x8xf32>
    %115 = arith.subf %111, %114 : vector<2x8xf32>
    %116 = math.exp %115 : vector<2x8xf32>
    %cst_32 = arith.constant dense<0.000000e+00> : vector<2xf32>
    %117 = vector.multi_reduction <add>, %116, %cst_32 [1] : vector<2x8xf32> to vector<2xf32>
    %118 = vector.shape_cast %117 : vector<2xf32> to vector<2x1xf32>
    %119 = tpu.reciprocal %118 {approx = true} : vector<2x1xf32> -> vector<2x1xf32>
    %120 = vector.broadcast %119 : vector<2x1xf32> to vector<2x8xf32>
    %121 = arith.mulf %116, %120 : vector<2x8xf32>
    %122 = vector.extract_strided_slice %33 {offsets = [0, 64], sizes = [2, 8], strides = [1, 1]} : vector<2x128xf32> to vector<2x8xf32>
    %cst_33 = arith.constant dense<0xFF800000> : vector<2xf32>
    %123 = vector.multi_reduction <maximumf>, %122, %cst_33 [1] : vector<2x8xf32> to vector<2xf32>
    %124 = vector.shape_cast %123 : vector<2xf32> to vector<2x1xf32>
    %125 = vector.broadcast %124 : vector<2x1xf32> to vector<2x8xf32>
    %126 = arith.subf %122, %125 : vector<2x8xf32>
    %127 = math.exp %126 : vector<2x8xf32>
    %cst_34 = arith.constant dense<0.000000e+00> : vector<2xf32>
    %128 = vector.multi_reduction <add>, %127, %cst_34 [1] : vector<2x8xf32> to vector<2xf32>
    %129 = vector.shape_cast %128 : vector<2xf32> to vector<2x1xf32>
    %130 = tpu.reciprocal %129 {approx = true} : vector<2x1xf32> -> vector<2x1xf32>
    %131 = vector.broadcast %130 : vector<2x1xf32> to vector<2x8xf32>
    %132 = arith.mulf %127, %131 : vector<2x8xf32>
    %133 = vector.extract_strided_slice %33 {offsets = [0, 72], sizes = [2, 8], strides = [1, 1]} : vector<2x128xf32> to vector<2x8xf32>
    %cst_35 = arith.constant dense<0xFF800000> : vector<2xf32>
    %134 = vector.multi_reduction <maximumf>, %133, %cst_35 [1] : vector<2x8xf32> to vector<2xf32>
    %135 = vector.shape_cast %134 : vector<2xf32> to vector<2x1xf32>
    %136 = vector.broadcast %135 : vector<2x1xf32> to vector<2x8xf32>
    %137 = arith.subf %133, %136 : vector<2x8xf32>
    %138 = math.exp %137 : vector<2x8xf32>
    %cst_36 = arith.constant dense<0.000000e+00> : vector<2xf32>
    %139 = vector.multi_reduction <add>, %138, %cst_36 [1] : vector<2x8xf32> to vector<2xf32>
    %140 = vector.shape_cast %139 : vector<2xf32> to vector<2x1xf32>
    %141 = tpu.reciprocal %140 {approx = true} : vector<2x1xf32> -> vector<2x1xf32>
    %142 = vector.broadcast %141 : vector<2x1xf32> to vector<2x8xf32>
    %143 = arith.mulf %138, %142 : vector<2x8xf32>
    %144 = vector.extract_strided_slice %33 {offsets = [0, 80], sizes = [2, 8], strides = [1, 1]} : vector<2x128xf32> to vector<2x8xf32>
    %cst_37 = arith.constant dense<0xFF800000> : vector<2xf32>
    %145 = vector.multi_reduction <maximumf>, %144, %cst_37 [1] : vector<2x8xf32> to vector<2xf32>
    %146 = vector.shape_cast %145 : vector<2xf32> to vector<2x1xf32>
    %147 = vector.broadcast %146 : vector<2x1xf32> to vector<2x8xf32>
    %148 = arith.subf %144, %147 : vector<2x8xf32>
    %149 = math.exp %148 : vector<2x8xf32>
    %cst_38 = arith.constant dense<0.000000e+00> : vector<2xf32>
    %150 = vector.multi_reduction <add>, %149, %cst_38 [1] : vector<2x8xf32> to vector<2xf32>
    %151 = vector.shape_cast %150 : vector<2xf32> to vector<2x1xf32>
    %152 = tpu.reciprocal %151 {approx = true} : vector<2x1xf32> -> vector<2x1xf32>
    %153 = vector.broadcast %152 : vector<2x1xf32> to vector<2x8xf32>
    %154 = arith.mulf %149, %153 : vector<2x8xf32>
    %155 = vector.extract_strided_slice %33 {offsets = [0, 88], sizes = [2, 8], strides = [1, 1]} : vector<2x128xf32> to vector<2x8xf32>
    %cst_39 = arith.constant dense<0xFF800000> : vector<2xf32>
    %156 = vector.multi_reduction <maximumf>, %155, %cst_39 [1] : vector<2x8xf32> to vector<2xf32>
    %157 = vector.shape_cast %156 : vector<2xf32> to vector<2x1xf32>
    %158 = vector.broadcast %157 : vector<2x1xf32> to vector<2x8xf32>
    %159 = arith.subf %155, %158 : vector<2x8xf32>
    %160 = math.exp %159 : vector<2x8xf32>
    %cst_40 = arith.constant dense<0.000000e+00> : vector<2xf32>
    %161 = vector.multi_reduction <add>, %160, %cst_40 [1] : vector<2x8xf32> to vector<2xf32>
    %162 = vector.shape_cast %161 : vector<2xf32> to vector<2x1xf32>
    %163 = tpu.reciprocal %162 {approx = true} : vector<2x1xf32> -> vector<2x1xf32>
    %164 = vector.broadcast %163 : vector<2x1xf32> to vector<2x8xf32>
    %165 = arith.mulf %160, %164 : vector<2x8xf32>
    %166 = vector.extract_strided_slice %33 {offsets = [0, 96], sizes = [2, 8], strides = [1, 1]} : vector<2x128xf32> to vector<2x8xf32>
    %cst_41 = arith.constant dense<0xFF800000> : vector<2xf32>
    %167 = vector.multi_reduction <maximumf>, %166, %cst_41 [1] : vector<2x8xf32> to vector<2xf32>
    %168 = vector.shape_cast %167 : vector<2xf32> to vector<2x1xf32>
    %169 = vector.broadcast %168 : vector<2x1xf32> to vector<2x8xf32>
    %170 = arith.subf %166, %169 : vector<2x8xf32>
    %171 = math.exp %170 : vector<2x8xf32>
    %cst_42 = arith.constant dense<0.000000e+00> : vector<2xf32>
    %172 = vector.multi_reduction <add>, %171, %cst_42 [1] : vector<2x8xf32> to vector<2xf32>
    %173 = vector.shape_cast %172 : vector<2xf32> to vector<2x1xf32>
    %174 = tpu.reciprocal %173 {approx = true} : vector<2x1xf32> -> vector<2x1xf32>
    %175 = vector.broadcast %174 : vector<2x1xf32> to vector<2x8xf32>
    %176 = arith.mulf %171, %175 : vector<2x8xf32>
    %177 = vector.extract_strided_slice %33 {offsets = [0, 104], sizes = [2, 8], strides = [1, 1]} : vector<2x128xf32> to vector<2x8xf32>
    %cst_43 = arith.constant dense<0xFF800000> : vector<2xf32>
    %178 = vector.multi_reduction <maximumf>, %177, %cst_43 [1] : vector<2x8xf32> to vector<2xf32>
    %179 = vector.shape_cast %178 : vector<2xf32> to vector<2x1xf32>
    %180 = vector.broadcast %179 : vector<2x1xf32> to vector<2x8xf32>
    %181 = arith.subf %177, %180 : vector<2x8xf32>
    %182 = math.exp %181 : vector<2x8xf32>
    %cst_44 = arith.constant dense<0.000000e+00> : vector<2xf32>
    %183 = vector.multi_reduction <add>, %182, %cst_44 [1] : vector<2x8xf32> to vector<2xf32>
    %184 = vector.shape_cast %183 : vector<2xf32> to vector<2x1xf32>
    %185 = tpu.reciprocal %184 {approx = true} : vector<2x1xf32> -> vector<2x1xf32>
    %186 = vector.broadcast %185 : vector<2x1xf32> to vector<2x8xf32>
    %187 = arith.mulf %182, %186 : vector<2x8xf32>
    %188 = vector.extract_strided_slice %33 {offsets = [0, 112], sizes = [2, 8], strides = [1, 1]} : vector<2x128xf32> to vector<2x8xf32>
    %cst_45 = arith.constant dense<0xFF800000> : vector<2xf32>
    %189 = vector.multi_reduction <maximumf>, %188, %cst_45 [1] : vector<2x8xf32> to vector<2xf32>
    %190 = vector.shape_cast %189 : vector<2xf32> to vector<2x1xf32>
    %191 = vector.broadcast %190 : vector<2x1xf32> to vector<2x8xf32>
    %192 = arith.subf %188, %191 : vector<2x8xf32>
    %193 = math.exp %192 : vector<2x8xf32>
    %cst_46 = arith.constant dense<0.000000e+00> : vector<2xf32>
    %194 = vector.multi_reduction <add>, %193, %cst_46 [1] : vector<2x8xf32> to vector<2xf32>
    %195 = vector.shape_cast %194 : vector<2xf32> to vector<2x1xf32>
    %196 = tpu.reciprocal %195 {approx = true} : vector<2x1xf32> -> vector<2x1xf32>
    %197 = vector.broadcast %196 : vector<2x1xf32> to vector<2x8xf32>
    %198 = arith.mulf %193, %197 : vector<2x8xf32>
    %199 = vector.extract_strided_slice %33 {offsets = [0, 120], sizes = [2, 8], strides = [1, 1]} : vector<2x128xf32> to vector<2x8xf32>
    %cst_47 = arith.constant dense<0xFF800000> : vector<2xf32>
    %200 = vector.multi_reduction <maximumf>, %199, %cst_47 [1] : vector<2x8xf32> to vector<2xf32>
    %201 = vector.shape_cast %200 : vector<2xf32> to vector<2x1xf32>
    %202 = vector.broadcast %201 : vector<2x1xf32> to vector<2x8xf32>
    %203 = arith.subf %199, %202 : vector<2x8xf32>
    %204 = math.exp %203 : vector<2x8xf32>
    %cst_48 = arith.constant dense<0.000000e+00> : vector<2xf32>
    %205 = vector.multi_reduction <add>, %204, %cst_48 [1] : vector<2x8xf32> to vector<2xf32>
    %206 = vector.shape_cast %205 : vector<2xf32> to vector<2x1xf32>
    %207 = tpu.reciprocal %206 {approx = true} : vector<2x1xf32> -> vector<2x1xf32>
    %208 = vector.broadcast %207 : vector<2x1xf32> to vector<2x8xf32>
    %209 = arith.mulf %204, %208 : vector<2x8xf32>
    %210 = tpu.concatenate %44, %55, %66, %77, %88, %99, %110, %121, %132, %143, %154, %165, %176, %187, %198, %209 in 1 : vector<2x8xf32>, vector<2x8xf32>, vector<2x8xf32>, vector<2x8xf32>, vector<2x8xf32>, vector<2x8xf32>, vector<2x8xf32>, vector<2x8xf32>, vector<2x8xf32>, vector<2x8xf32>, vector<2x8xf32>, vector<2x8xf32>, vector<2x8xf32>, vector<2x8xf32>, vector<2x8xf32>, vector<2x8xf32> -> vector<2x128xf32>
    %211 = arith.truncf %210 : vector<2x128xf32> to vector<2x128xbf16>
    %c0_49 = arith.constant 0 : index
    %c0_50 = arith.constant 0 : index
    %212 = vector.load %arg7[%c0_49, %c0_50] : memref<128x512xbf16, #tpu.memory_space<vmem>>, vector<128x512xbf16>
    %cst_51 = arith.constant dense<0.000000e+00> : vector<2x512xf32>
    %213 = tpu.matmul %211, %212, %cst_51 {dimension_numbers = #tpu.dot_dimension_numbers<[1], [0], [0], [1], [0, 0, 1, 1], [], []>} : vector<2x128xbf16>, vector<128x512xbf16>, vector<2x512xf32> -> vector<2x512xf32>
    %c0_52 = arith.constant 0 : index
    %c0_53 = arith.constant 0 : index
    %214 = vector.load %arg8[%c0_52, %c0_53] : memref<2x512xf32, #tpu.memory_space<vmem>>, vector<2x512xf32>
    tpu.vector_store %arg8[%c0_52, %c0_53], %213 {strides = array<i32>} : memref<2x512xf32, #tpu.memory_space<vmem>>, vector<2x512xf32>,
    return
  }
  func.func @transform_0(%arg0: i32) -> (i32, i32) {
    %c0_i32 = arith.constant 0 : i32
    %c0_i32_0 = arith.constant 0 : i32
    return %arg0, %c0_i32 : i32, i32
  }
  func.func @transform_1(%arg0: i32) -> (i32, i32) {
    %c0_i32 = arith.constant 0 : i32
    %c0_i32_0 = arith.constant 0 : i32
    %c0_i32_1 = arith.constant 0 : i32
    return %c0_i32, %c0_i32_0 : i32, i32
  }
  func.func @transform_2(%arg0: i32) -> (i32, i32) {
    %c0_i32 = arith.constant 0 : i32
    %c0_i32_0 = arith.constant 0 : i32
    %c0_i32_1 = arith.constant 0 : i32
    return %c0_i32, %c0_i32_0 : i32, i32
  }
  func.func @transform_3(%arg0: i32) -> (i32, i32) {
    %c0_i32 = arith.constant 0 : i32
    %c0_i32_0 = arith.constant 0 : i32
    %c0_i32_1 = arith.constant 0 : i32
    return %c0_i32, %c0_i32_0 : i32, i32
  }
  func.func @transform_4(%arg0: i32) -> (i32, i32) {
    %c0_i32 = arith.constant 0 : i32
    %c0_i32_0 = arith.constant 0 : i32
    %c0_i32_1 = arith.constant 0 : i32
    return %c0_i32, %c0_i32_0 : i32, i32
  }
  func.func @transform_5(%arg0: i32) -> (i32, i32) {
    %c0_i32 = arith.constant 0 : i32
    %c0_i32_0 = arith.constant 0 : i32
    %c0_i32_1 = arith.constant 0 : i32
    return %c0_i32, %c0_i32_0 : i32, i32
  }
  func.func @transform_6(%arg0: i32) -> (i32, i32) {
    %c0_i32 = arith.constant 0 : i32
    %c0_i32_0 = arith.constant 0 : i32
    %c0_i32_1 = arith.constant 0 : i32
    return %c0_i32, %c0_i32_0 : i32, i32
  }
  func.func @transform_7(%arg0: i32) -> (i32, i32) {
    %c0_i32 = arith.constant 0 : i32
    %c0_i32_0 = arith.constant 0 : i32
    return %arg0, %c0_i32 : i32, i32
  }
}

module attributes {stable_mosaic.version = 11 : i64} {
  func.func @qkv_ps_kernel(%arg0: i32, %arg1: memref<2x32xf32, #tpu.memory_space<vmem>>, %arg2: memref<32x32xbf16, #tpu.memory_space<vmem>>, %arg3: memref<1x32xf32, #tpu.memory_space<vmem>>, %arg4: memref<1x32xf32, #tpu.memory_space<vmem>>, %arg5: memref<1x32xf32, #tpu.memory_space<vmem>>, %arg6: memref<32x128xbf16, #tpu.memory_space<vmem>>, %arg7: memref<128x512xbf16, #tpu.memory_space<vmem>>, %arg8: memref<2x512xf32, #tpu.memory_space<vmem>>) attributes {dimension_semantics = [#tpu.dimension_semantics<parallel>], iteration_bounds = array<i64: 1>, scalar_prefetch = 0 : i64, scratch_operands = 0 : i64, tpu.core_type = #tpu.core_type<tc>, window_params = [{transform_indices = @transform_0, window_bounds = array<i64: 2, 32>}, {pipeline_mode = #tpu.pipeline_mode<synchronous>, transform_indices = @transform_1, window_bounds = array<i64: 32, 32>}, {pipeline_mode = #tpu.pipeline_mode<synchronous>, transform_indices = @transform_2, window_bounds = array<i64: 1, 32>}, {pipeline_mode = #tpu.pipeline_mode<synchronous>, transform_indices = @transform_3, window_bounds = array<i64: 1, 32>}, {pipeline_mode = #tpu.pipeline_mode<synchronous>, transform_indices = @transform_4, window_bounds = array<i64: 1, 32>}, {pipeline_mode = #tpu.pipeline_mode<synchronous>, transform_indices = @transform_5, window_bounds = array<i64: 32, 128>}, {pipeline_mode = #tpu.pipeline_mode<synchronous>, transform_indices = @transform_6, window_bounds = array<i64: 128, 512>}, {transform_indices = @transform_7, window_bounds = array<i64: 2, 512>}]} {
    %c0 = arith.constant 0 : index
    %c0_0 = arith.constant 0 : index
    %0 = vector.load %arg1[%c0, %c0_0] : memref<2x32xf32, #tpu.memory_space<vmem>>, vector<2x32xf32>
    %cst = arith.constant dense<0.000000e+00> : vector<2xf32>
    %1 = vector.multi_reduction <add>, %0, %cst [1] : vector<2x32xf32> to vector<2xf32>
    %2 = vector.shape_cast %1 : vector<2xf32> to vector<2x1xf32>
    %cst_1 = arith.constant 3.200000e+01 : f32
    %3 = vector.broadcast %cst_1 : f32 to vector<2x1xf32>
    %4 = arith.divf %2, %3 : vector<2x1xf32>
    %5 = vector.broadcast %4 : vector<2x1xf32> to vector<2x32xf32>
    %6 = arith.subf %0, %5 : vector<2x32xf32>
    %7 = arith.mulf %6, %6 : vector<2x32xf32>
    %cst_2 = arith.constant dense<0.000000e+00> : vector<2xf32>
    %8 = vector.multi_reduction <add>, %7, %cst_2 [1] : vector<2x32xf32> to vector<2xf32>
    %9 = vector.shape_cast %8 : vector<2xf32> to vector<2x1xf32>
    %cst_3 = arith.constant 3.200000e+01 : f32
    %10 = vector.broadcast %cst_3 : f32 to vector<2x1xf32>
    %11 = arith.divf %9, %10 : vector<2x1xf32>
    %12 = vector.broadcast %4 : vector<2x1xf32> to vector<2x32xf32>
    %13 = arith.subf %0, %12 : vector<2x32xf32>
    %cst_4 = arith.constant 9.99999974E-6 : f32
    %14 = vector.broadcast %cst_4 : f32 to vector<2x1xf32>
    %15 = arith.addf %11, %14 : vector<2x1xf32>
    %16 = math.rsqrt %15 : vector<2x1xf32>
    %17 = vector.broadcast %16 : vector<2x1xf32> to vector<2x32xf32>
    %18 = arith.mulf %13, %17 : vector<2x32xf32>
    %c0_5 = arith.constant 0 : index
    %c0_6 = arith.constant 0 : index
    %19 = vector.load %arg4[%c0_5, %c0_6] : memref<1x32xf32, #tpu.memory_space<vmem>>, vector<1x32xf32>
    %20 = vector.broadcast %19 : vector<1x32xf32> to vector<2x32xf32>
    %21 = arith.mulf %18, %20 : vector<2x32xf32>
    %c0_7 = arith.constant 0 : index
    %c0_8 = arith.constant 0 : index
    %22 = vector.load %arg5[%c0_7, %c0_8] : memref<1x32xf32, #tpu.memory_space<vmem>>, vector<1x32xf32>
    %23 = vector.broadcast %22 : vector<1x32xf32> to vector<2x32xf32>
    %24 = arith.addf %21, %23 : vector<2x32xf32>
    %25 = arith.truncf %24 : vector<2x32xf32> to vector<2x32xbf16>
    %c0_9 = arith.constant 0 : index
    %c0_10 = arith.constant 0 : index
    %26 = vector.load %arg2[%c0_9, %c0_10] : memref<32x32xbf16, #tpu.memory_space<vmem>>, vector<32x32xbf16>
    %cst_11 = arith.constant dense<0.000000e+00> : vector<2x32xf32>
    %27 = tpu.matmul %25, %26, %cst_11 {dimension_numbers = #tpu.dot_dimension_numbers<[1], [0], [0], [1], [0, 0, 1, 1], [], []>} : vector<2x32xbf16>, vector<32x32xbf16>, vector<2x32xf32> -> vector<2x32xf32>
    %c0_12 = arith.constant 0 : index
    %c0_13 = arith.constant 0 : index
    %28 = vector.load %arg3[%c0_12, %c0_13] : memref<1x32xf32, #tpu.memory_space<vmem>>, vector<1x32xf32>
    %29 = vector.broadcast %28 : vector<1x32xf32> to vector<2x32xf32>
    %30 = arith.addf %27, %29 : vector<2x32xf32>
    %31 = arith.truncf %30 : vector<2x32xf32> to vector<2x32xbf16>
    %c0_14 = arith.constant 0 : index
    %c0_15 = arith.constant 0 : index
    %32 = vector.load %arg6[%c0_14, %c0_15] : memref<32x128xbf16, #tpu.memory_space<vmem>>, vector<32x128xbf16>
    %cst_16 = arith.constant dense<0.000000e+00> : vector<2x128xf32>
    %33 = tpu.matmul %31, %32, %cst_16 {dimension_numbers = #tpu.dot_dimension_numbers<[1], [0], [0], [1], [0, 0, 1, 1], [], []>} : vector<2x32xbf16>, vector<32x128xbf16>, vector<2x128xf32> -> vector<2x128xf32>
    %34 = vector.extract_strided_slice %33 {offsets = [0, 0], sizes = [2, 8], strides = [1, 1]} : vector<2x128xf32> to vector<2x8xf32>
    %cst_17 = arith.constant dense<0xFF800000> : vector<2xf32>
    %35 = vector.multi_reduction <maximumf>, %34, %cst_17 [1] : vector<2x8xf32> to vector<2xf32>
    %36 = vector.shape_cast %35 : vector<2xf32> to vector<2x1xf32>
    %37 = vector.broadcast %36 : vector<2x1xf32> to vector<2x8xf32>
    %38 = arith.subf %34, %37 : vector<2x8xf32>
    %39 = math.exp %38 : vector<2x8xf32>
    %cst_18 = arith.constant dense<0.000000e+00> : vector<2xf32>
    %40 = vector.multi_reduction <add>, %39, %cst_18 [1] : vector<2x8xf32> to vector<2xf32>
    %41 = vector.shape_cast %40 : vector<2xf32> to vector<2x1xf32>
    %42 = tpu.reciprocal %41 {approx = true} : vector<2x1xf32> -> vector<2x1xf32>
    %43 = vector.broadcast %42 : vector<2x1xf32> to vector<2x8xf32>
    %44 = arith.mulf %39, %43 : vector<2x8xf32>
    %45 = vector.extract_strided_slice %33 {offsets = [0, 8], sizes = [2, 8], strides = [1, 1]} : vector<2x128xf32> to vector<2x8xf32>
    %cst_19 = arith.constant dense<0xFF800000> : vector<2xf32>
    %46 = vector.multi_reduction <maximumf>, %45, %cst_19 [1] : vector<2x8xf32> to vector<2xf32>
    %47 = vector.shape_cast %46 : vector<2xf32> to vector<2x1xf32>
    %48 = vector.broadcast %47 : vector<2x1xf32> to vector<2x8xf32>
    %49 = arith.subf %45, %48 : vector<2x8xf32>
    %50 = math.exp %49 : vector<2x8xf32>
    %cst_20 = arith.constant dense<0.000000e+00> : vector<2xf32>
    %51 = vector.multi_reduction <add>, %50, %cst_20 [1] : vector<2x8xf32> to vector<2xf32>
    %52 = vector.shape_cast %51 : vector<2xf32> to vector<2x1xf32>
    %53 = tpu.reciprocal %52 {approx = true} : vector<2x1xf32> -> vector<2x1xf32>
    %54 = vector.broadcast %53 : vector<2x1xf32> to vector<2x8xf32>
    %55 = arith.mulf %50, %54 : vector<2x8xf32>
    %56 = vector.extract_strided_slice %33 {offsets = [0, 16], sizes = [2, 8], strides = [1, 1]} : vector<2x128xf32> to vector<2x8xf32>
    %cst_21 = arith.constant dense<0xFF800000> : vector<2xf32>
    %57 = vector.multi_reduction <maximumf>, %56, %cst_21 [1] : vector<2x8xf32> to vector<2xf32>
    %58 = vector.shape_cast %57 : vector<2xf32> to vector<2x1xf32>
    %59 = vector.broadcast %58 : vector<2x1xf32> to vector<2x8xf32>
    %60 = arith.subf %56, %59 : vector<2x8xf32>
    %61 = math.exp %60 : vector<2x8xf32>
    %cst_22 = arith.constant dense<0.000000e+00> : vector<2xf32>
    %62 = vector.multi_reduction <add>, %61, %cst_22 [1] : vector<2x8xf32> to vector<2xf32>
    %63 = vector.shape_cast %62 : vector<2xf32> to vector<2x1xf32>
    %64 = tpu.reciprocal %63 {approx = true} : vector<2x1xf32> -> vector<2x1xf32>
    %65 = vector.broadcast %64 : vector<2x1xf32> to vector<2x8xf32>
    %66 = arith.mulf %61, %65 : vector<2x8xf32>
    %67 = vector.extract_strided_slice %33 {offsets = [0, 24], sizes = [2, 8], strides = [1, 1]} : vector<2x128xf32> to vector<2x8xf32>
    %cst_23 = arith.constant dense<0xFF800000> : vector<2xf32>
    %68 = vector.multi_reduction <maximumf>, %67, %cst_23 [1] : vector<2x8xf32> to vector<2xf32>
    %69 = vector.shape_cast %68 : vector<2xf32> to vector<2x1xf32>
    %70 = vector.broadcast %69 : vector<2x1xf32> to vector<2x8xf32>
    %71 = arith.subf %67, %70 : vector<2x8xf32>
    %72 = math.exp %71 : vector<2x8xf32>
    %cst_24 = arith.constant dense<0.000000e+00> : vector<2xf32>
    %73 = vector.multi_reduction <add>, %72, %cst_24 [1] : vector<2x8xf32> to vector<2xf32>
    %74 = vector.shape_cast %73 : vector<2xf32> to vector<2x1xf32>
    %75 = tpu.reciprocal %74 {approx = true} : vector<2x1xf32> -> vector<2x1xf32>
    %76 = vector.broadcast %75 : vector<2x1xf32> to vector<2x8xf32>
    %77 = arith.mulf %72, %76 : vector<2x8xf32>
    %78 = vector.extract_strided_slice %33 {offsets = [0, 32], sizes = [2, 8], strides = [1, 1]} : vector<2x128xf32> to vector<2x8xf32>
    %cst_25 = arith.constant dense<0xFF800000> : vector<2xf32>
    %79 = vector.multi_reduction <maximumf>, %78, %cst_25 [1] : vector<2x8xf32> to vector<2xf32>
    %80 = vector.shape_cast %79 : vector<2xf32> to vector<2x1xf32>
    %81 = vector.broadcast %80 : vector<2x1xf32> to vector<2x8xf32>
    %82 = arith.subf %78, %81 : vector<2x8xf32>
    %83 = math.exp %82 : vector<2x8xf32>
    %cst_26 = arith.constant dense<0.000000e+00> : vector<2xf32>
    %84 = vector.multi_reduction <add>, %83, %cst_26 [1] : vector<2x8xf32> to vector<2xf32>
    %85 = vector.shape_cast %84 : vector<2xf32> to vector<2x1xf32>
    %86 = tpu.reciprocal %85 {approx = true} : vector<2x1xf32> -> vector<2x1xf32>
    %87 = vector.broadcast %86 : vector<2x1xf32> to vector<2x8xf32>
    %88 = arith.mulf %83, %87 : vector<2x8xf32>
    %89 = vector.extract_strided_slice %33 {offsets = [0, 40], sizes = [2, 8], strides = [1, 1]} : vector<2x128xf32> to vector<2x8xf32>
    %cst_27 = arith.constant dense<0xFF800000> : vector<2xf32>
    %90 = vector.multi_reduction <maximumf>, %89, %cst_27 [1] : vector<2x8xf32> to vector<2xf32>
    %91 = vector.shape_cast %90 : vector<2xf32> to vector<2x1xf32>
    %92 = vector.broadcast %91 : vector<2x1xf32> to vector<2x8xf32>
    %93 = arith.subf %89, %92 : vector<2x8xf32>
    %94 = math.exp %93 : vector<2x8xf32>
    %cst_28 = arith.constant dense<0.000000e+00> : vector<2xf32>
    %95 = vector.multi_reduction <add>, %94, %cst_28 [1] : vector<2x8xf32> to vector<2xf32>
    %96 = vector.shape_cast %95 : vector<2xf32> to vector<2x1xf32>
    %97 = tpu.reciprocal %96 {approx = true} : vector<2x1xf32> -> vector<2x1xf32>
    %98 = vector.broadcast %97 : vector<2x1xf32> to vector<2x8xf32>
    %99 = arith.mulf %94, %98 : vector<2x8xf32>
    %100 = vector.extract_strided_slice %33 {offsets = [0, 48], sizes = [2, 8], strides = [1, 1]} : vector<2x128xf32> to vector<2x8xf32>
    %cst_29 = arith.constant dense<0xFF800000> : vector<2xf32>
    %101 = vector.multi_reduction <maximumf>, %100, %cst_29 [1] : vector<2x8xf32> to vector<2xf32>
    %102 = vector.shape_cast %101 : vector<2xf32> to vector<2x1xf32>
    %103 = vector.broadcast %102 : vector<2x1xf32> to vector<2x8xf32>
    %104 = arith.subf %100, %103 : vector<2x8xf32>
    %105 = math.exp %104 : vector<2x8xf32>
    %cst_30 = arith.constant dense<0.000000e+00> : vector<2xf32>
    %106 = vector.multi_reduction <add>, %105, %cst_30 [1] : vector<2x8xf32> to vector<2xf32>
    %107 = vector.shape_cast %106 : vector<2xf32> to vector<2x1xf32>
    %108 = tpu.reciprocal %107 {approx = true} : vector<2x1xf32> -> vector<2x1xf32>
    %109 = vector.broadcast %108 : vector<2x1xf32> to vector<2x8xf32>
    %110 = arith.mulf %105, %109 : vector<2x8xf32>
    %111 = vector.extract_strided_slice %33 {offsets = [0, 56], sizes = [2, 8], strides = [1, 1]} : vector<2x128xf32> to vector<2x8xf32>
    %cst_31 = arith.constant dense<0xFF800000> : vector<2xf32>
    %112 = vector.multi_reduction <maximumf>, %111, %cst_31 [1] : vector<2x8xf32> to vector<2xf32>
    %113 = vector.shape_cast %112 : vector<2xf32> to vector<2x1xf32>
    %114 = vector.broadcast %113 : vector<2x1xf32> to vector<2x8xf32>
    %115 = arith.subf %111, %114 : vector<2x8xf32>
    %116 = math.exp %115 : vector<2x8xf32>
    %cst_32 = arith.constant dense<0.000000e+00> : vector<2xf32>
    %117 = vector.multi_reduction <add>, %116, %cst_32 [1] : vector<2x8xf32> to vector<2xf32>
    %118 = vector.shape_cast %117 : vector<2xf32> to vector<2x1xf32>
    %119 = tpu.reciprocal %118 {approx = true} : vector<2x1xf32> -> vector<2x1xf32>
    %120 = vector.broadcast %119 : vector<2x1xf32> to vector<2x8xf32>
    %121 = arith.mulf %116, %120 : vector<2x8xf32>
    %122 = vector.extract_strided_slice %33 {offsets = [0, 64], sizes = [2, 8], strides = [1, 1]} : vector<2x128xf32> to vector<2x8xf32>
    %cst_33 = arith.constant dense<0xFF800000> : vector<2xf32>
    %123 = vector.multi_reduction <maximumf>, %122, %cst_33 [1] : vector<2x8xf32> to vector<2xf32>
    %124 = vector.shape_cast %123 : vector<2xf32> to vector<2x1xf32>
    %125 = vector.broadcast %124 : vector<2x1xf32> to vector<2x8xf32>
    %126 = arith.subf %122, %125 : vector<2x8xf32>
    %127 = math.exp %126 : vector<2x8xf32>
    %cst_34 = arith.constant dense<0.000000e+00> : vector<2xf32>
    %128 = vector.multi_reduction <add>, %127, %cst_34 [1] : vector<2x8xf32> to vector<2xf32>
    %129 = vector.shape_cast %128 : vector<2xf32> to vector<2x1xf32>
    %130 = tpu.reciprocal %129 {approx = true} : vector<2x1xf32> -> vector<2x1xf32>
    %131 = vector.broadcast %130 : vector<2x1xf32> to vector<2x8xf32>
    %132 = arith.mulf %127, %131 : vector<2x8xf32>
    %133 = vector.extract_strided_slice %33 {offsets = [0, 72], sizes = [2, 8], strides = [1, 1]} : vector<2x128xf32> to vector<2x8xf32>
    %cst_35 = arith.constant dense<0xFF800000> : vector<2xf32>
    %134 = vector.multi_reduction <maximumf>, %133, %cst_35 [1] : vector<2x8xf32> to vector<2xf32>
    %135 = vector.shape_cast %134 : vector<2xf32> to vector<2x1xf32>
    %136 = vector.broadcast %135 : vector<2x1xf32> to vector<2x8xf32>
    %137 = arith.subf %133, %136 : vector<2x8xf32>
    %138 = math.exp %137 : vector<2x8xf32>
    %cst_36 = arith.constant dense<0.000000e+00> : vector<2xf32>
    %139 = vector.multi_reduction <add>, %138, %cst_36 [1] : vector<2x8xf32> to vector<2xf32>
    %140 = vector.shape_cast %139 : vector<2xf32> to vector<2x1xf32>
    %141 = tpu.reciprocal %140 {approx = true} : vector<2x1xf32> -> vector<2x1xf32>
    %142 = vector.broadcast %141 : vector<2x1xf32> to vector<2x8xf32>
    %143 = arith.mulf %138, %142 : vector<2x8xf32>
    %144 = vector.extract_strided_slice %33 {offsets = [0, 80], sizes = [2, 8], strides = [1, 1]} : vector<2x128xf32> to vector<2x8xf32>
    %cst_37 = arith.constant dense<0xFF800000> : vector<2xf32>
    %145 = vector.multi_reduction <maximumf>, %144, %cst_37 [1] : vector<2x8xf32> to vector<2xf32>
    %146 = vector.shape_cast %145 : vector<2xf32> to vector<2x1xf32>
    %147 = vector.broadcast %146 : vector<2x1xf32> to vector<2x8xf32>
    %148 = arith.subf %144, %147 : vector<2x8xf32>
    %149 = math.exp %148 : vector<2x8xf32>
    %cst_38 = arith.constant dense<0.000000e+00> : vector<2xf32>
    %150 = vector.multi_reduction <add>, %149, %cst_38 [1] : vector<2x8xf32> to vector<2xf32>
    %151 = vector.shape_cast %150 : vector<2xf32> to vector<2x1xf32>
    %152 = tpu.reciprocal %151 {approx = true} : vector<2x1xf32> -> vector<2x1xf32>
    %153 = vector.broadcast %152 : vector<2x1xf32> to vector<2x8xf32>
    %154 = arith.mulf %149, %153 : vector<2x8xf32>
    %155 = vector.extract_strided_slice %33 {offsets = [0, 88], sizes = [2, 8], strides = [1, 1]} : vector<2x128xf32> to vector<2x8xf32>
    %cst_39 = arith.constant dense<0xFF800000> : vector<2xf32>
    %156 = vector.multi_reduction <maximumf>, %155, %cst_39 [1] : vector<2x8xf32> to vector<2xf32>
    %157 = vector.shape_cast %156 : vector<2xf32> to vector<2x1xf32>
    %158 = vector.broadcast %157 : vector<2x1xf32> to vector<2x8xf32>
    %159 = arith.subf %155, %158 : vector<2x8xf32>
    %160 = math.exp %159 : vector<2x8xf32>
    %cst_40 = arith.constant dense<0.000000e+00> : vector<2xf32>
    %161 = vector.multi_reduction <add>, %160, %cst_40 [1] : vector<2x8xf32> to vector<2xf32>
    %162 = vector.shape_cast %161 : vector<2xf32> to vector<2x1xf32>
    %163 = tpu.reciprocal %162 {approx = true} : vector<2x1xf32> -> vector<2x1xf32>
    %164 = vector.broadcast %163 : vector<2x1xf32> to vector<2x8xf32>
    %165 = arith.mulf %160, %164 : vector<2x8xf32>
    %166 = vector.extract_strided_slice %33 {offsets = [0, 96], sizes = [2, 8], strides = [1, 1]} : vector<2x128xf32> to vector<2x8xf32>
    %cst_41 = arith.constant dense<0xFF800000> : vector<2xf32>
    %167 = vector.multi_reduction <maximumf>, %166, %cst_41 [1] : vector<2x8xf32> to vector<2xf32>
    %168 = vector.shape_cast %167 : vector<2xf32> to vector<2x1xf32>
    %169 = vector.broadcast %168 : vector<2x1xf32> to vector<2x8xf32>
    %170 = arith.subf %166, %169 : vector<2x8xf32>
    %171 = math.exp %170 : vector<2x8xf32>
    %cst_42 = arith.constant dense<0.000000e+00> : vector<2xf32>
    %172 = vector.multi_reduction <add>, %171, %cst_42 [1] : vector<2x8xf32> to vector<2xf32>
    %173 = vector.shape_cast %172 : vector<2xf32> to vector<2x1xf32>
    %174 = tpu.reciprocal %173 {approx = true} : vector<2x1xf32> -> vector<2x1xf32>
    %175 = vector.broadcast %174 : vector<2x1xf32> to vector<2x8xf32>
    %176 = arith.mulf %171, %175 : vector<2x8xf32>
    %177 = vector.extract_strided_slice %33 {offsets = [0, 104], sizes = [2, 8], strides = [1, 1]} : vector<2x128xf32> to vector<2x8xf32>
    %cst_43 = arith.constant dense<0xFF800000> : vector<2xf32>
    %178 = vector.multi_reduction <maximumf>, %177, %cst_43 [1] : vector<2x8xf32> to vector<2xf32>
    %179 = vector.shape_cast %178 : vector<2xf32> to vector<2x1xf32>
    %180 = vector.broadcast %179 : vector<2x1xf32> to vector<2x8xf32>
    %181 = arith.subf %177, %180 : vector<2x8xf32>
    %182 = math.exp %181 : vector<2x8xf32>
    %cst_44 = arith.constant dense<0.000000e+00> : vector<2xf32>
    %183 = vector.multi_reduction <add>, %182, %cst_44 [1] : vector<2x8xf32> to vector<2xf32>
    %184 = vector.shape_cast %183 : vector<2xf32> to vector<2x1xf32>
    %185 = tpu.reciprocal %184 {approx = true} : vector<2x1xf32> -> vector<2x1xf32>
    %186 = vector.broadcast %185 : vector<2x1xf32> to vector<2x8xf32>
    %187 = arith.mulf %182, %186 : vector<2x8xf32>
    %188 = vector.extract_strided_slice %33 {offsets = [0, 112], sizes = [2, 8], strides = [1, 1]} : vector<2x128xf32> to vector<2x8xf32>
    %cst_45 = arith.constant dense<0xFF800000> : vector<2xf32>
    %189 = vector.multi_reduction <maximumf>, %188, %cst_45 [1] : vector<2x8xf32> to vector<2xf32>
    %190 = vector.shape_cast %189 : vector<2xf32> to vector<2x1xf32>
    %191 = vector.broadcast %190 : vector<2x1xf32> to vector<2x8xf32>
    %192 = arith.subf %188, %191 : vector<2x8xf32>
    %193 = math.exp %192 : vector<2x8xf32>
    %cst_46 = arith.constant dense<0.000000e+00> : vector<2xf32>
    %194 = vector.multi_reduction <add>, %193, %cst_46 [1] : vector<2x8xf32> to vector<2xf32>
    %195 = vector.shape_cast %194 : vector<2xf32> to vector<2x1xf32>
    %196 = tpu.reciprocal %195 {approx = true} : vector<2x1xf32> -> vector<2x1xf32>
    %197 = vector.broadcast %196 : vector<2x1xf32> to vector<2x8xf32>
    %198 = arith.mulf %193, %197 : vector<2x8xf32>
    %199 = vector.extract_strided_slice %33 {offsets = [0, 120], sizes = [2, 8], strides = [1, 1]} : vector<2x128xf32> to vector<2x8xf32>
    %cst_47 = arith.constant dense<0xFF800000> : vector<2xf32>
    %200 = vector.multi_reduction <maximumf>, %199, %cst_47 [1] : vector<2x8xf32> to vector<2xf32>
    %201 = vector.shape_cast %200 : vector<2xf32> to vector<2x1xf32>
    %202 = vector.broadcast %201 : vector<2x1xf32> to vector<2x8xf32>
    %203 = arith.subf %199, %202 : vector<2x8xf32>
    %204 = math.exp %203 : vector<2x8xf32>
    %cst_48 = arith.constant dense<0.000000e+00> : vector<2xf32>
    %205 = vector.multi_reduction <add>, %204, %cst_48 [1] : vector<2x8xf32> to vector<2xf32>
    %206 = vector.shape_cast %205 : vector<2xf32> to vector<2x1xf32>
    %207 = tpu.reciprocal %206 {approx = true} : vector<2x1xf32> -> vector<2x1xf32>
    %208 = vector.broadcast %207 : vector<2x1xf32> to vector<2x8xf32>
    %209 = arith.mulf %204, %208 : vector<2x8xf32>
    %210 = tpu.concatenate %44, %55, %66, %77, %88, %99, %110, %121, %132, %143, %154, %165, %176, %187, %198, %209 in 1 : vector<2x8xf32>, vector<2x8xf32>, vector<2x8xf32>, vector<2x8xf32>, vector<2x8xf32>, vector<2x8xf32>, vector<2x8xf32>, vector<2x8xf32>, vector<2x8xf32>, vector<2x8xf32>, vector<2x8xf32>, vector<2x8xf32>, vector<2x8xf32>, vector<2x8xf32>, vector<2x8xf32>, vector<2x8xf32> -> vector<2x128xf32>
    %211 = arith.truncf %210 : vector<2x128xf32> to vector<2x128xbf16>
    %c0_49 = arith.constant 0 : index
    %c0_50 = arith.constant 0 : index
    %212 = vector.load %arg7[%c0_49, %c0_50] : memref<128x512xbf16, #tpu.memory_space<vmem>>, vector<128x512xbf16>
    %cst_51 = arith.constant dense<0.000000e+00> : vector<2x512xf32>
    %213 = tpu.matmul %211, %212, %cst_51 {dimension_numbers = #tpu.dot_dimension_numbers<[1], [0], [0], [1], [0, 0, 1, 1], [], []>} : vector<2x128xbf16>, vector<128x512xbf16>, vector<2x512xf32> -> vector<2x512xf32>
    %c0_52 = arith.constant 0 : index
    %c0_53 = arith.constant 0 : index
    %214 = vector.load %arg8[%c0_52, %c0_53] : memref<2x512xf32, #tpu.memory_space<vmem>>, vector<2x512xf32>
    tpu.vector_store %arg8[%c0_52, %c0_53], %213 {strides = array<i32>} : memref<2x512xf32, #tpu.memory_space<vmem>>, vector<2x512xf32>,
    return
  }
  func.func @transform_0(%arg0: i32) -> (i32, i32) {
    %c0_i32 = arith.constant 0 : i32
    %c0_i32_0 = arith.constant 0 : i32
    return %arg0, %c0_i32 : i32, i32
  }
  func.func @transform_1(%arg0: i32) -> (i32, i32) {
    %c0_i32 = arith.constant 0 : i32
    %c0_i32_0 = arith.constant 0 : i32
    %c0_i32_1 = arith.constant 0 : i32
    return %c0_i32, %c0_i32_0 : i32, i32
  }
  func.func @transform_2(%arg0: i32) -> (i32, i32) {
    %c0_i32 = arith.constant 0 : i32
    %c0_i32_0 = arith.constant 0 : i32
    %c0_i32_1 = arith.constant 0 : i32
    return %c0_i32, %c0_i32_0 : i32, i32
  }
  func.func @transform_3(%arg0: i32) -> (i32, i32) {
    %c0_i32 = arith.constant 0 : i32
    %c0_i32_0 = arith.constant 0 : i32
    %c0_i32_1 = arith.constant 0 : i32
    return %c0_i32, %c0_i32_0 : i32, i32
  }
  func.func @transform_4(%arg0: i32) -> (i32, i32) {
    %c0_i32 = arith.constant 0 : i32
    %c0_i32_0 = arith.constant 0 : i32
    %c0_i32_1 = arith.constant 0 : i32
    return %c0_i32, %c0_i32_0 : i32, i32
  }
  func.func @transform_5(%arg0: i32) -> (i32, i32) {
    %c0_i32 = arith.constant 0 : i32
    %c0_i32_0 = arith.constant 0 : i32
    %c0_i32_1 = arith.constant 0 : i32
    return %c0_i32, %c0_i32_0 : i32, i32
  }
  func.func @transform_6(%arg0: i32) -> (i32, i32) {
    %c0_i32 = arith.constant 0 : i32
    %c0_i32_0 = arith.constant 0 : i32
    %c0_i32_1 = arith.constant 0 : i32
    return %c0_i32, %c0_i32_0 : i32, i32
  }
  func.func @transform_7(%arg0: i32) -> (i32, i32) {
    %c0_i32 = arith.constant 0 : i32
    %c0_i32_0 = arith.constant 0 : i32
    return %arg0, %c0_i32 : i32, i32
  }
}

</mosaic_0001>

<bundles_post_ra>
// kernel: tpu_custom_call.1
= control target key start
LH: loop header
LB: loop body
LE: loop exit
PB: predicated region body
PF: predicated region fallthrough
CT: control target
= control target key end

     0   :  { %12 = vsyncpa [#allocation3], 0  ;;  %s1421_s0 = inlined_call_operand.hbm [shape: f32[2,32], index: 0, kind: input, shape index: {}]   ;;  %s1422_s1 = inlined_call_operand.hbm [shape: bf16[32,32], index: 1, kind: input, shape index: {}]   ;;  %s1423_s2 = inlined_call_operand.vmem [shape: f32[1,32], index: 2, kind: input, shape index: {}]   ;;  %s1424_s3 = inlined_call_operand.vmem [shape: f32[1,32], index: 3, kind: input, shape index: {}]   ;;  %s1425_s4 = inlined_call_operand.hbm [shape: f32[1,32], index: 4, kind: input, shape index: {}]   ;;  %s1426_s5 = inlined_call_operand.vmem [shape: bf16[32,128], index: 5, kind: input, shape index: {}]   ;;  %s1427_s6 = inlined_call_operand.hbm [shape: bf16[128,512], index: 6, kind: input, shape index: {}]   ;;  %s1428_s7 = inlined_call_operand.hbm [shape: f32[2,512], index: 7, kind: output, shape index: {}]  }
   0x1   :  { %13 = vsyncpa [#allocation6], 0 }
   0x2   :  { %14 = vsyncpa [#allocation9], 0 }
   0x3   :  { %15 = vsyncpa [#allocation4], 0  ;;  %s1160_s24 = smov [#allocation5]   ;;  %s1042_s28 = scalar_lea.hbm %s1422_s1, 256 }
   0x4   :  { %s31_s25 = sshll.u32 %s1160_s24, 4  ;;  %p1043_p0 = scmp.ne.s32.totalorder %s1422_s1, %s1042_s28  ;;  %s32_s25 = int_to_ptr.vmem [resolvable:$true] %s31_s25 }
   0x5   :  { %p1046_p1 = scmp.lt.u32.totalorder %s1042_s28, %s1422_s1 }
   0x7   :  { %p1048_p2 = pnand %p1046_p1, %p1043_p0 }
   0x9   :  { %1051 = shalt.err (!%p1048_p2)
}
   0xa   :  { %s1052_s10 = scalar_lea.vmem %s32_s25, 256  ;;  %p1057_p4 = scmp.lt.s32.totalorder %s32_s25, %s32_s25 }
   0xb   :  { %p1053_p3 = scmp.ne.s32.totalorder %s32_s25, %s1052_s10  ;;  %p1058_p5 = scmp.lt.s32.totalorder %s1052_s10, %s1052_s10 }
   0xd   :  { %p1059_p6 = por %p1058_p5, %p1057_p4 }
   0xf   :  { %p1060_p7 = pnand %p1059_p6, %p1053_p3 }
  0x11   :  { %1063 = shalt.err (!%p1060_p7)
}
  0x12   :  { %s1161_s11 = smov 64   ;;  %s1162_s12 = smov 4  }
  0x13   :  { %37 = dma.hbm_to_vmem [thread:$0]  %s1422_s1, 256, %s32_s25, [#allocation6], %s1161_s11, %s1161_s11, %s1162_s12  }
  0x14   :  { %s1163_s15 = smov [#allocation2]   ;;  %s1164_s17 = smov [#allocation7]  }
  0x15   :  { %s22_s16 = sshll.u32 %s1163_s15, 4  ;;  %s48_s18 = sshll.u32 %s1164_s17, 4  ;;  %s23_s16 = int_to_ptr.vmem [resolvable:$true] %s22_s16  ;;  %s49_s18 = int_to_ptr.vmem [resolvable:$true] %s48_s18 }
  0x16   :  { %s1064_s21 = scalar_lea.hbm %s1421_s0, 32 }
  0x17   :  { %p1065_p8 = scmp.ne.s32.totalorder %s1421_s0, %s1064_s21  ;;  %p1068_p9 = scmp.lt.u32.totalorder %s1064_s21, %s1421_s0 }
  0x19   :  { %p1070_p10 = pnand %p1068_p9, %p1065_p8 }
  0x1b   :  { %1073 = shalt.err (!%p1070_p10)
}
  0x1c   :  { %s1074_s1 = scalar_lea.vmem %s23_s16, 32  ;;  %p1079_p12 = scmp.lt.s32.totalorder %s23_s16, %s23_s16 }
  0x1d   :  { %p1075_p11 = scmp.ne.s32.totalorder %s23_s16, %s1074_s1  ;;  %p1080_p13 = scmp.lt.s32.totalorder %s1074_s1, %s1074_s1 }
  0x1f   :  { %p1081_p0 = por %p1080_p13, %p1079_p12 }
  0x21   :  { %p1082_p1 = pnand %p1081_p0, %p1075_p11 }
  0x23   :  { %1085 = shalt.err (!%p1082_p1)
}
  0x24   :  { %25 = dma.hbm_to_vmem [thread:$0]  %s1421_s0, 32, %s23_s16, [#allocation3]  }
  0x25   :  { %s1086_s30 = scalar_lea.hbm %s1425_s4, 16 }
  0x26   :  { %p1087_p2 = scmp.ne.s32.totalorder %s1425_s4, %s1086_s30  ;;  %p1090_p3 = scmp.lt.u32.totalorder %s1086_s30, %s1425_s4 }
  0x28   :  { %p1092_p4 = pnand %p1090_p3, %p1087_p2 }
  0x2a   :  { %1095 = shalt.err (!%p1092_p4)
}
  0x2b   :  { %s1096_s13 = scalar_lea.vmem %s49_s18, 16  ;;  %s1100_s14 = scalar_lea.vmem %s49_s18, 32 }
  0x2c   :  { %p1097_p5 = scmp.ne.s32.totalorder %s49_s18, %s1096_s13  ;;  %p1101_p6 = scmp.lt.s32.totalorder %s49_s18, %s49_s18 }
  0x2d   :  { %p1102_p7 = scmp.lt.s32.totalorder %s1100_s14, %s1096_s13 }
  0x2f   :  { %p1103_p8 = por %p1102_p7, %p1101_p6 }
  0x31   :  { %p1104_p9 = pnand %p1103_p8, %p1097_p5 }
  0x33   :  { %1107 = shalt.err (!%p1104_p9)
}
  0x34   :  { %51 = dma.hbm_to_vmem [thread:$0]  %s1425_s4, 16, %s49_s18, [#allocation6]  }
  0x35   :  { %s1165_s16 = smov [#allocation8]   ;;  %s1108_s21 = scalar_lea.hbm %s1427_s6, 4096 }
  0x36   :  { %s59_s17 = sshll.u32 %s1165_s16, 4  ;;  %p1109_p10 = scmp.ne.s32.totalorder %s1427_s6, %s1108_s21  ;;  %s60_s17 = int_to_ptr.vmem [resolvable:$true] %s59_s17 }
  0x37   :  { %p1112_p11 = scmp.lt.u32.totalorder %s1108_s21, %s1427_s6 }
  0x39   :  { %p1114_p12 = pnand %p1112_p11, %p1109_p10 }
  0x3b   :  { %1117 = shalt.err (!%p1114_p12)
}
  0x3c   :  { %s1118_s1 = scalar_lea.vmem %s60_s17, 4096  ;;  %p1123_p0 = scmp.lt.s32.totalorder %s60_s17, %s60_s17 }
  0x3d   :  { %p1119_p13 = scmp.ne.s32.totalorder %s60_s17, %s1118_s1  ;;  %p1124_p1 = scmp.lt.s32.totalorder %s1118_s1, %s1118_s1 }
  0x3f   :  { %p1125_p2 = por %p1124_p1, %p1123_p0 }
  0x41   :  { %p1126_p3 = pnand %p1125_p2, %p1119_p13 }
  0x43   :  { %1129 = shalt.err (!%p1126_p3)
}
  0x44   :  { %s1166_s4 = smov 256   ;;  %s1167_s18 = smov 16  }
  0x45   :  { %65 = dma.hbm_to_vmem [thread:$0]  %s1427_s6, 4096, %s60_s17, [#allocation9], %s1166_s4, %s1166_s4, %s1167_s18  }
  0x46   :  { %1152 = dma.done.wait [#allocation3], 32  }
  0x47   :  { %1153 = vsyncadd [#allocation3], 4294967264 }
  0x48   :  { %1154 = dma.done.wait [#allocation6], 272  }
  0x49   :  { %1155 = vsyncadd [#allocation6], 4294967024 }
  0x4a   :  { %1156 = dma.done.wait [#allocation9], 4096  }
  0x4b   :  { %1157 = vsyncadd [#allocation9], 4294963200  ;;  %vm80_vm0 = vcmask 254976   ;;  %v79_v0 = vld [vmem:[#allocation2] sm:$0x3]  ;;  %v924_v7 = vld [vmem:[#allocation5] sm:$0xff]  }
  0x4c   :  { %v81_v1 = vsel %vm80_vm0, %v79_v0, 0.0  ;;  %v1168_v8 = vmov 0.0   ;;  %vm1169_vm1 = vmmov 0   ;;  %v925_v9 = vld [vmem:[#allocation5 + $0x8] sm:$0xff]   ;;  %v836_v17 = vld [vmem:[#allocation7] ss:$0 sm:$0xff] }
  0x4d   :  { %82 = vadd.xlane.f32.xlu0 %v81_v1  ;;  %882 = vmatprep.subr.bf16.mxu0 %v1168_v8  ;;  %v926_v10 = vld [vmem:[%s1426_s5] sm:$0xff]   ;;  %vm135_vm2 = vcmask 261120   ;;  %v927_v21 = vld [vmem:[%s1426_s5 + $0x8] sm:$0xff]   ;;  %vm283_vm3 = vcmask 255168   ;;  %vm251_vm4 = vcmask 123968   ;;  %vm315_vm5 = vcmask 386368  }
  0x4e   :  { %886 = vmatprep.mubr.msk.bf16.mxu0 %vm1169_vm1, %v1168_v8  ;;  %883 = vmatpush3.bf16.msra.mxu0 %v924_v7  ;;  %v835_v15 = vld [vmem:[%s1424_s3] ss:$0 sm:$0xff]  ;;  %vm267_vm6 = vcmask 189568   ;;  %vm347_vm7 = vcmask 517568   ;;  %vm299_vm8 = vcmask 320768   ;;  %vm379_vm9 = vcmask 648768  }
  0x4f   :  { %890 = vmatprep.subr.bf16.mxu1 %v1168_v8  ;;  %884 = vmatprep.subr.bf16.mxu0 %v1168_v8  ;;  %v837_v22 = vld [vmem:[%s1423_s2] ss:$0 sm:$0xff]  ;;  %vm331_vm10 = vcmask 451968   ;;  %vm411_vm11 = vcmask 779968   ;;  %vm363_vm12 = vcmask 583168   ;;  %vm443_vm13 = vcmask 911168  }
  0x50   :  { %894 = vmatprep.mubr.msk.bf16.mxu1 %vm1169_vm1, %v1168_v8  ;;  %891 = vmatpush3.bf16.msra.mxu1 %v926_v10  ;;  %vm395_vm14 = vcmask 714368   ;;  %vm475_vm15 = vcmask 1042368   ;;  %vm459_vm1 = vcmask 976768   ;;  %s1170_s2 = smov 120   ;;  %s1171_s3 = smov 112  }
  0x51   :  { %892 = vmatprep.subr.bf16.mxu1 %v1168_v8  ;;  %s1172_s5 = smov 104   ;;  %s1173_s13 = smov 72  }
  0x52   :  { %885 = vmatpush3.bf16.msra.mxu0 %v925_v9  ;;  %s1174_s14 = smov 96   ;;  %s1175_s0 = smov 56  }
  0x53   :  { %s1176_s15 = smov 88   ;;  %s1177_s16 = smov 40  }
  0x54   :  { %893 = vmatpush3.bf16.msra.mxu1 %v927_v21  ;;  %s1178_s17 = smov 80   ;;  %s1179_s19 = smov 24  }
  0x55   :  { %s1180_s20 = smov 8   ;;  %s1181_s21 = smov 48  }
  0x56   :  { %s1182_s22 = smov 32  }
  0xda   :  { %v83_v2 = vpop.xlane.xlu0 %82 }
  0xdb   :  { %v85_v3 = vmul.f32 0.03125, %v83_v2 }
  0xdd   :  { %v86_v4 = vsub.f32 %v79_v0, %v85_v3 }
  0xdf   :  { %v87_v5 = vmul.f32 %v86_v4, %v86_v4 }
  0xe1   :  { %v88_v6 = vsel %vm80_vm0, %v87_v5, 0.0  ;;  %vm427_vm0 = vcmask 845568  }
  0xe2   :  { %89 = vadd.xlane.f32.xlu0 %v88_v6 }
 0x16f   :  { %v90_v11 = vpop.xlane.xlu0 %89 }
 0x170   :  { %v91_v12 = vmul.f32 0.03125, %v90_v11 }
 0x172   :  { %v92_v13 = vadd.f32 1e-05, %v91_v12 }
 0x174   :  { %976 = vrsqrt.f32 %v92_v13 }
 0x17e   :  { %v977_v14 = vpop.eup %976 }
 0x17f   :  { %v94_v16 = vmul.f32 %v977_v14, %v86_v4 }
 0x181   :  { %v102_v18 = vmul.f32 %v835_v15, %v94_v16 }
 0x183   :  { %v110_v19 = vadd.f32 %v836_v17, %v102_v18 }
 0x185   :  { %v111_v20 = vpack.c.bf16 %v110_v19, %v110_v19 }
 0x187   :  { %887 = vmatmul.mubr.msk.bf16.vlgmr.msra.gmra.mrb[0].mxu0 %vm135_vm2, %v111_v20 }
 0x25a   :  { %v173_v23 = vpop.f32.mrb[0].mxu0 }
 0x25b   :  { %v174_v24 = vadd.f32 %v837_v22, %v173_v23  ;;  %v888_v25 = vpop.f32.mrb[1].mxu0 }
 0x25c   :  { %v176_v26 = vpop.f32.mrb[2].mxu0 }
 0x25d   :  { %v179_v27 = vpack.c.bf16 %v174_v24, %v174_v24  ;;  %v889_v28 = vpop.f32.mrb[3].mxu0 }
 0x25f   :  { %895 = vmatmul.mubr.msk.bf16.vlgmr.msra.gmra.mrb[0].mxu1 %vm135_vm2, %v179_v27 }
 0x332   :  { %v1291_v29 = vpop.f32.mrb[0].mxu1 }
 0x333   :  { %v896_v30 = vpop.f32.mrb[1].mxu1  ;;  %v284_v31 = vsel %vm283_vm3, %v1291_v29, -inf  ;;  %v252_v32 = vsel %vm251_vm4, %v1291_v29, -inf  ;;  %v316_v35 = vsel %vm315_vm5, %v1291_v29, -inf  ;;  %v268_v36 = vsel %vm267_vm6, %v1291_v29, -inf }
 0x334   :  { %285 = vmax.xlane.f32.xlu0 %v284_v31  ;;  %253 = vmax.xlane.f32.xlu1 %v252_v32  ;;  %v236_v33 = vpop.f32.mrb[2].mxu1  ;;  %v348_v37 = vsel %vm347_vm7, %v1291_v29, -inf  ;;  %v300_v38 = vsel %vm299_vm8, %v1291_v29, -inf  ;;  %v380_v39 = vsel %vm379_vm9, %v1291_v29, -inf  ;;  %v332_v40 = vsel %vm331_vm10, %v1291_v29, -inf }
 0x335   :  { %v897_v34 = vpop.f32.mrb[3].mxu1  ;;  %v412_v41 = vsel %vm411_vm11, %v1291_v29, -inf  ;;  %v364_v42 = vsel %vm363_vm12, %v1291_v29, -inf  ;;  %v444_v43 = vsel %vm443_vm13, %v1291_v29, -inf  ;;  %v396_v44 = vsel %vm395_vm14, %v1291_v29, -inf }
 0x336   :  { %v476_v45 = vsel %vm475_vm15, %v1291_v29, -inf  ;;  %v428_v46 = vsel %vm427_vm0, %v1291_v29, -inf  ;;  %v460_v47 = vsel %vm459_vm1, %v1291_v29, -inf  ;;  %vm239_vm3 = vcmask 58368  }
 0x337   :  { %v240_v48 = vsel %vm239_vm3, %v1291_v29, -inf  ;;  %vm491_vm4 = vcmask 64512   ;;  %vm493_vm5 = vcmask 130048   ;;  %vm495_vm6 = vcmask 195584  }
 0x338   :  { %317 = vmax.xlane.f32.xlu0 %v316_v35  ;;  %269 = vmax.xlane.f32.xlu1 %v268_v36  ;;  %vm498_vm7 = vcmask 326656   ;;  %vm500_vm8 = vcmask 392192   ;;  %vm502_vm9 = vcmask 457728   ;;  %vm504_vm10 = vcmask 523264  }
 0x339   :  { %vm508_vm11 = vcmask 654336   ;;  %vm510_vm12 = vcmask 719872   ;;  %vm512_vm13 = vcmask 785408   ;;  %vm514_vm14 = vcmask 850944  }
 0x33a   :  { %vm516_vm15 = vcmask 916480   ;;  %vm518_vm0 = vcmask 982016  }
 0x33c   :  { %349 = vmax.xlane.f32.xlu0 %v348_v37  ;;  %301 = vmax.xlane.f32.xlu1 %v300_v38 }
 0x340   :  { %381 = vmax.xlane.f32.xlu0 %v380_v39  ;;  %333 = vmax.xlane.f32.xlu1 %v332_v40 }
 0x344   :  { %413 = vmax.xlane.f32.xlu0 %v412_v41  ;;  %365 = vmax.xlane.f32.xlu1 %v364_v42 }
 0x348   :  { %445 = vmax.xlane.f32.xlu0 %v444_v43  ;;  %397 = vmax.xlane.f32.xlu1 %v396_v44 }
 0x34c   :  { %477 = vmax.xlane.f32.xlu0 %v476_v45  ;;  %429 = vmax.xlane.f32.xlu1 %v428_v46 }
 0x350   :  { %461 = vmax.xlane.f32.xlu1 %v460_v47 }
 0x354   :  { %241 = vmax.xlane.f32.xlu1 %v240_v48 }
 0x3c1   :  { %v286_v49 = vpop.xlane.xlu0 %285  ;;  %v254_v50 = vpop.xlane.xlu1 %253 }
 0x3c2   :  { %v287_v51 = vsub.f32 %v1291_v29, %v286_v49  ;;  %v255_v52 = vsub.f32 %v1291_v29, %v254_v50 }
 0x3c4   :  { %v256_v53 = vmul.f32 1.442695, %v255_v52  ;;  %v288_v56 = vmul.f32 1.442695, %v287_v51 }
 0x3c5   :  { %v318_v54 = vpop.xlane.xlu0 %317  ;;  %v270_v55 = vpop.xlane.xlu1 %269 }
 0x3c6   :  { %v271_v57 = vsub.f32 %v1291_v29, %v270_v55  ;;  %978 = vpow2.f32 %v256_v53  ;;  %v319_v63 = vsub.f32 %v1291_v29, %v318_v54 }
 0x3c7   :  { %980 = vpow2.f32 %v288_v56 }
 0x3c8   :  { %v272_v58 = vmul.f32 1.442695, %v271_v57  ;;  %v320_v5 = vmul.f32 1.442695, %v319_v63 }
 0x3c9   :  { %v350_v59 = vpop.xlane.xlu0 %349  ;;  %v302_v60 = vpop.xlane.xlu1 %301 }
 0x3ca   :  { %v351_v61 = vsub.f32 %v1291_v29, %v350_v59  ;;  %v303_v62 = vsub.f32 %v1291_v29, %v302_v60  ;;  %982 = vpow2.f32 %v272_v58 }
 0x3cc   :  { %v352_v0 = vmul.f32 1.442695, %v351_v61  ;;  %v304_v1 = vmul.f32 1.442695, %v303_v62 }
 0x3cd   :  { %v382_v2 = vpop.xlane.xlu0 %381  ;;  %v334_v3 = vpop.xlane.xlu1 %333 }
 0x3ce   :  { %984 = vpow2.f32 %v352_v0  ;;  %v383_v4 = vsub.f32 %v1291_v29, %v382_v2  ;;  %v335_v6 = vsub.f32 %v1291_v29, %v334_v3 }
 0x3cf   :  { %986 = vpow2.f32 %v304_v1 }
 0x3d0   :  { %v384_v7 = vmul.f32 1.442695, %v383_v4  ;;  %v1318_v8 = vpop.eup %978  ;;  %v336_v12 = vmul.f32 1.442695, %v335_v6 }
 0x3d1   :  { %v414_v9 = vpop.xlane.xlu0 %413  ;;  %v366_v10 = vpop.xlane.xlu1 %365  ;;  %259 = vrot.lane.b32.xlu1 %v1318_v8, %s1170_s2 }
 0x3d2   :  { %988 = vpow2.f32 %v384_v7  ;;  %v415_v11 = vsub.f32 %v1291_v29, %v414_v9  ;;  %v367_v13 = vsub.f32 %v1291_v29, %v366_v10  ;;  %v1323_v14 = vpop.eup %980 }
 0x3d3   :  { %990 = vpow2.f32 %v320_v5 }
 0x3d4   :  { %v416_v15 = vmul.f32 1.442695, %v415_v11  ;;  %v1325_v16 = vpop.eup %982  ;;  %v368_v20 = vmul.f32 1.442695, %v367_v13 }
 0x3d5   :  { %v446_v17 = vpop.xlane.xlu0 %445  ;;  %v398_v18 = vpop.xlane.xlu1 %397  ;;  %275 = vrot.lane.b32.xlu0 %v1325_v16, %s1171_s3  ;;  %291 = vrot.lane.b32.xlu1 %v1323_v14, %s1172_s5 }
 0x3d6   :  { %992 = vpow2.f32 %v416_v15  ;;  %v447_v19 = vsub.f32 %v1291_v29, %v446_v17  ;;  %v399_v21 = vsub.f32 %v1291_v29, %v398_v18 }
 0x3d7   :  { %994 = vpow2.f32 %v336_v12 }
 0x3d8   :  { %v1331_v22 = vpop.eup %984  ;;  %v448_v23 = vmul.f32 1.442695, %v447_v19  ;;  %v400_v28 = vmul.f32 1.442695, %v399_v21  ;;  %v930_v19 = vld [vmem:[#allocation8 + $0x4] ss:$16 sps:$4 sm:$0xff]  }
 0x3d9   :  { %v1333_v24 = vpop.eup %986  ;;  %v478_v25 = vpop.xlane.xlu0 %477  ;;  %355 = vrot.lane.b32.xlu0 %v1331_v22, %s1173_s13  ;;  %v928_v21 = vld [vmem:[#allocation8] ss:$16 sps:$4 sm:$0xff]   ;;  %713 = vmatprep.subr.bf16.mxu0 %v930_v19 }
 0x3da   :  { %v430_v26 = vpop.xlane.xlu1 %429  ;;  %996 = vpow2.f32 %v448_v23  ;;  %v479_v27 = vsub.f32 %v1291_v29, %v478_v25  ;;  %307 = vrot.lane.b32.xlu1 %v1333_v24, %s1174_s14  ;;  %v931_v23 = vld [vmem:[#allocation8 + $0x8] ss:$16 sps:$4 sm:$0xff]   ;;  %714 = vmatpush1.bf16.msra.mxu0 %v928_v21  ;;  %v936_v25 = vld [vmem:[#allocation8 + $0x24] ss:$16 sps:$4 sm:$0xff]  }
 0x3db   :  { %998 = vpow2.f32 %v368_v20  ;;  %v431_v30 = vsub.f32 %v1291_v29, %v430_v26  ;;  %v933_v20 = vld [vmem:[#allocation8 + $0xc] ss:$16 sps:$4 sm:$0xff]   ;;  %715 = vmatprep.subr.bf16.mxu0 %v936_v25 }
 0x3dc   :  { %v1339_v31 = vpop.eup %988  ;;  %v480_v32 = vmul.f32 1.442695, %v479_v27  ;;  %754 = vmatprep.subr.bf16.mxu1 %v933_v20  ;;  %v939_v26 = vld [vmem:[#allocation8 + $0x2c] ss:$16 sps:$4 sm:$0xff]   ;;  %v934_v27 = vld [vmem:[#allocation8 + $0x20] ss:$16 sps:$4 sm:$0xff]  }
 0x3dd   :  { %v1341_v33 = vpop.eup %990  ;;  %387 = vrot.lane.b32.xlu0 %v1339_v31, %s1175_s0  ;;  %v432_v35 = vmul.f32 1.442695, %v431_v30  ;;  %755 = vmatpush1.bf16.msra.mxu1 %v931_v23  ;;  %v942_v30 = vld [vmem:[#allocation8 + $0x44] ss:$16 sps:$4 sm:$0xff]  }
 0x3de   :  { %v462_v34 = vpop.xlane.xlu1 %461  ;;  %1000 = vpow2.f32 %v480_v32  ;;  %323 = vrot.lane.b32.xlu1 %v1341_v33, %s1176_s15  ;;  %756 = vmatprep.subr.bf16.mxu1 %v939_v26  ;;  %v945_v32 = vld [vmem:[#allocation8 + $0x4c] ss:$16 sps:$4 sm:$0xff]  }
 0x3df   :  { %1002 = vpow2.f32 %v400_v28  ;;  %v463_v36 = vsub.f32 %v1291_v29, %v462_v34  ;;  %v937_v28 = vld [vmem:[#allocation8 + $0x28] ss:$16 sps:$4 sm:$0xff]   ;;  %716 = vmatpush1.bf16.msra.mxu0 %v934_v27  ;;  %v940_v34 = vld [vmem:[#allocation8 + $0x40] ss:$16 sps:$4 sm:$0xff]  }
 0x3e0   :  { %v1346_v37 = vpop.eup %992  ;;  %1004 = vpow2.f32 %v432_v35  ;;  %v943_v35 = vld [vmem:[#allocation8 + $0x48] ss:$16 sps:$4 sm:$0xff]   ;;  %717 = vmatprep.subr.bf16.mxu0 %v942_v30 }
 0x3e1   :  { %v1348_v38 = vpop.eup %994  ;;  %419 = vrot.lane.b32.xlu0 %v1346_v37, %s1177_s16  ;;  %v464_v39 = vmul.f32 1.442695, %v463_v36  ;;  %757 = vmatpush1.bf16.msra.mxu1 %v937_v28  ;;  %v948_v36 = vld [vmem:[#allocation8 + $0x64] ss:$16 sps:$4 sm:$0xff]  }
 0x3e2   :  { %339 = vrot.lane.b32.xlu1 %v1348_v38, %s1178_s17  ;;  %v242_v45 = vpop.xlane.xlu1 %241  ;;  %758 = vmatprep.subr.bf16.mxu1 %v945_v32 }
 0x3e3   :  { %1006 = vpow2.f32 %v464_v39  ;;  %v243_v47 = vsub.f32 %v1291_v29, %v242_v45  ;;  %718 = vmatpush1.bf16.msra.mxu0 %v940_v34  ;;  %v951_v39 = vld [vmem:[#allocation8 + $0x6c] ss:$16 sps:$4 sm:$0xff]   ;;  %v946_v45 = vld [vmem:[#allocation8 + $0x60] ss:$16 sps:$4 sm:$0xff]  }
 0x3e4   :  { %v1352_v40 = vpop.eup %996  ;;  %719 = vmatprep.subr.bf16.mxu0 %v948_v36 }
 0x3e5   :  { %v1354_v41 = vpop.eup %998  ;;  %451 = vrot.lane.b32.xlu0 %v1352_v40, %s1179_s19  ;;  %v244_v48 = vmul.f32 1.442695, %v243_v47  ;;  %759 = vmatpush1.bf16.msra.mxu1 %v943_v35  ;;  %v949_v47 = vld [vmem:[#allocation8 + $0x68] ss:$16 sps:$4 sm:$0xff]  }
 0x3e6   :  { %371 = vrot.lane.b32.xlu1 %v1354_v41, %s1161_s11  ;;  %760 = vmatprep.subr.bf16.mxu1 %v951_v39  ;;  %s1185_s11 = smov [#allocation10]  }
 0x3e7   :  { %1008 = vpow2.f32 %v244_v48  ;;  %720 = vmatpush1.bf16.msra.mxu0 %v946_v45  ;;  %v954_v48 = vld [vmem:[#allocation8 + $0x84] ss:$16 sps:$4 sm:$0xff]   ;;  %s824_s23 = sshll.u32 %s1185_s11, 4  ;;  %s825_s23 = int_to_ptr.vmem [resolvable:$true] %s824_s23 }
 0x3e8   :  { %v1359_v42 = vpop.eup %1000  ;;  %721 = vmatprep.subr.bf16.mxu0 %v954_v48  ;;  %s1130_s24 = scalar_lea.vmem %s825_s23, 128  ;;  %p1135_p5 = scmp.lt.s32.totalorder %s825_s23, %s825_s23 }
 0x3e9   :  { %v1361_v43 = vpop.eup %1002  ;;  %483 = vrot.lane.b32.xlu0 %v1359_v42, %s1180_s20  ;;  %761 = vmatpush1.bf16.msra.mxu1 %v949_v47  ;;  %p1131_p4 = scmp.ne.s32.totalorder %s825_s23, %s1130_s24  ;;  %p1136_p6 = scmp.lt.s32.totalorder %s1130_s24, %s1130_s24 }
 0x3ea   :  { %403 = vrot.lane.b32.xlu1 %v1361_v43, %s1181_s21  ;;  %v1365_v44 = vpop.eup %1004 }
 0x3eb   :  { %p1137_p7 = por %p1136_p6, %p1135_p5 }
 0x3ed   :  { %v1368_v46 = vpop.eup %1006  ;;  %p1138_p8 = pnand %p1137_p7, %p1131_p4 }
 0x3ee   :  { %435 = vrot.lane.b32.xlu1 %v1365_v44, %s1182_s22 }
 0x3f1   :  { %v1373_v49 = vpop.eup %1008 }
 0x3f2   :  { %467 = vrot.lane.b32.xlu1 %v1368_v46, %s1167_s18  ;;  %v246_v50 = vsel %vm239_vm3, %v1373_v49, 0.0 }
 0x408   :  { %247 = vadd.xlane.f32.xlu0 %v246_v50  ;;  %v957_v50 = vld [vmem:[#allocation8 + $0x8c] ss:$16 sps:$4 sm:$0xff]  }
 0x409   :  { %762 = vmatprep.subr.bf16.mxu1 %v957_v50 }
 0x443   :  { %v260_v51 = vpop.permute.xlu1 %259 }
 0x444   :  { %v262_v52 = vsel %vm239_vm3, %v260_v51, 0.0  ;;  %v952_v51 = vld [vmem:[#allocation8 + $0x80] ss:$16 sps:$4 sm:$0xff]  }
 0x445   :  { %263 = vadd.xlane.f32.xlu0 %v262_v52  ;;  %v955_v52 = vld [vmem:[#allocation8 + $0x88] ss:$16 sps:$4 sm:$0xff]   ;;  %722 = vmatpush1.bf16.msra.mxu0 %v952_v51 }
 0x446   :  { %763 = vmatpush1.bf16.msra.mxu1 %v955_v52 }
 0x447   :  { %v276_v53 = vpop.permute.xlu0 %275  ;;  %v292_v54 = vpop.permute.xlu1 %291 }
 0x448   :  { %v278_v55 = vsel %vm239_vm3, %v276_v53, 0.0  ;;  %v294_v56 = vsel %vm239_vm3, %v292_v54, 0.0  ;;  %v960_v53 = vld [vmem:[#allocation8 + $0xa4] ss:$16 sps:$4 sm:$0xff]   ;;  %v963_v54 = vld [vmem:[#allocation8 + $0xac] ss:$16 sps:$4 sm:$0xff]  }
 0x449   :  { %279 = vadd.xlane.f32.xlu1 %v278_v55  ;;  %295 = vadd.xlane.f32.xlu0 %v294_v56  ;;  %v958_v55 = vld [vmem:[#allocation8 + $0xa0] ss:$16 sps:$4 sm:$0xff]   ;;  %v961_v56 = vld [vmem:[#allocation8 + $0xa8] ss:$16 sps:$4 sm:$0xff]  }
 0x44a   :  { %723 = vmatprep.subr.bf16.mxu0 %v960_v53  ;;  %764 = vmatprep.subr.bf16.mxu1 %v963_v54 }
 0x44b   :  { %v356_v29 = vpop.permute.xlu0 %355  ;;  %724 = vmatpush1.bf16.msra.mxu0 %v958_v55  ;;  %765 = vmatpush1.bf16.msra.mxu1 %v961_v56 }
 0x44c   :  { %v308_v57 = vpop.permute.xlu1 %307  ;;  %v358_v63 = vsel %vm239_vm3, %v356_v29, 0.0  ;;  %v966_v29 = vld [vmem:[#allocation8 + $0xc4] ss:$16 sps:$4 sm:$0xff]  }
 0x44d   :  { %v310_v58 = vsel %vm239_vm3, %v308_v57, 0.0  ;;  %v969_v57 = vld [vmem:[#allocation8 + $0xcc] ss:$16 sps:$4 sm:$0xff]   ;;  %725 = vmatprep.subr.bf16.mxu0 %v966_v29 }
 0x44e   :  { %311 = vadd.xlane.f32.xlu0 %v310_v58  ;;  %v964_v58 = vld [vmem:[#allocation8 + $0xc0] ss:$16 sps:$4 sm:$0xff]   ;;  %766 = vmatprep.subr.bf16.mxu1 %v969_v57 }
 0x44f   :  { %v388_v59 = vpop.permute.xlu0 %387  ;;  %726 = vmatpush1.bf16.msra.mxu0 %v964_v58 }
 0x450   :  { %v324_v60 = vpop.permute.xlu1 %323  ;;  %v390_v3 = vsel %vm239_vm3, %v388_v59, 0.0  ;;  %v967_v59 = vld [vmem:[#allocation8 + $0xc8] ss:$16 sps:$4 sm:$0xff]  }
 0x451   :  { %v326_v61 = vsel %vm239_vm3, %v324_v60, 0.0  ;;  %767 = vmatpush1.bf16.msra.mxu1 %v967_v59  ;;  %v970_v60 = vld [vmem:[#allocation8 + $0xe0] ss:$16 sps:$4 sm:$0xff]  }
 0x452   :  { %327 = vadd.xlane.f32.xlu0 %v326_v61  ;;  %v972_v61 = vld [vmem:[#allocation8 + $0xe4] ss:$16 sps:$4 sm:$0xff]  }
 0x453   :  { %v420_v1 = vpop.permute.xlu0 %419  ;;  %727 = vmatprep.subr.bf16.mxu0 %v972_v61 }
 0x454   :  { %v340_v62 = vpop.permute.xlu1 %339  ;;  %v422_v7 = vsel %vm239_vm3, %v420_v1, 0.0  ;;  %728 = vmatpush1.bf16.msra.mxu0 %v970_v60 }
 0x455   :  { %v342_v0 = vsel %vm239_vm3, %v340_v62, 0.0  ;;  %v973_v62 = vld [vmem:[#allocation8 + $0xe8] ss:$16 sps:$4 sm:$0xff]  }
 0x456   :  { %359 = vadd.xlane.f32.xlu0 %v358_v63  ;;  %343 = vadd.xlane.f32.xlu1 %v342_v0  ;;  %v975_v63 = vld [vmem:[#allocation8 + $0xec] ss:$16 sps:$4 sm:$0xff]   ;;  %v1183_v0 = vmov 0  }
 0x457   :  { %v452_v5 = vpop.permute.xlu0 %451  ;;  %745 = vmatprep.mubr.bf16.mxu0 %v1183_v0  ;;  %768 = vmatprep.subr.bf16.mxu1 %v975_v63 }
 0x458   :  { %v372_v2 = vpop.permute.xlu1 %371  ;;  %v454_v11 = vsel %vm239_vm3, %v452_v5, 0.0  ;;  %786 = vmatprep.mubr.bf16.mxu1 %v1183_v0  ;;  %769 = vmatpush1.bf16.msra.mxu1 %v973_v62 }
 0x459   :  { %v374_v4 = vsel %vm239_vm3, %v372_v2, 0.0 }
 0x45a   :  { %391 = vadd.xlane.f32.xlu0 %v390_v3  ;;  %375 = vadd.xlane.f32.xlu1 %v374_v4 }
 0x45b   :  { %v484_v13 = vpop.permute.xlu0 %483 }
 0x45c   :  { %v404_v6 = vpop.permute.xlu1 %403  ;;  %v486_v17 = vsel %vm239_vm3, %v484_v13, 0.0 }
 0x45d   :  { %v406_v9 = vsel %vm239_vm3, %v404_v6, 0.0 }
 0x45e   :  { %423 = vadd.xlane.f32.xlu0 %v422_v7  ;;  %407 = vadd.xlane.f32.xlu1 %v406_v9 }
 0x460   :  { %v436_v10 = vpop.permute.xlu1 %435 }
 0x461   :  { %v438_v12 = vsel %vm239_vm3, %v436_v10, 0.0 }
 0x462   :  { %455 = vadd.xlane.f32.xlu0 %v454_v11  ;;  %439 = vadd.xlane.f32.xlu1 %v438_v12 }
 0x464   :  { %v468_v15 = vpop.permute.xlu1 %467 }
 0x465   :  { %v470_v18 = vsel %vm239_vm3, %v468_v15, 0.0 }
 0x466   :  { %487 = vadd.xlane.f32.xlu0 %v486_v17  ;;  %471 = vadd.xlane.f32.xlu1 %v470_v18 }
 0x495   :  { %v248_v1 = vpop.xlane.xlu0 %247 }
 0x4d2   :  { %v264_v2 = vpop.xlane.xlu0 %263 }
 0x4d3   :  { %1010 = vrcp.f32 %v264_v2 }
 0x4d6   :  { %v296_v3 = vpop.xlane.xlu0 %295  ;;  %v280_v4 = vpop.xlane.xlu1 %279 }
 0x4d7   :  { %1012 = vrcp.f32 %v280_v4 }
 0x4d8   :  { %1014 = vrcp.f32 %v248_v1 }
 0x4d9   :  { %1016 = vrcp.f32 %v296_v3 }
 0x4db   :  { %v312_v5 = vpop.xlane.xlu0 %311 }
 0x4dc   :  { %1018 = vrcp.f32 %v312_v5 }
 0x4dd   :  { %v1011_v10 = vpop.eup %1010 }
 0x4de   :  { %v266_v13 = vmul.f32 %v1011_v10, %v1318_v8 }
 0x4df   :  { %v328_v6 = vpop.xlane.xlu0 %327 }
 0x4e0   :  { %1020 = vrcp.f32 %v328_v6 }
 0x4e1   :  { %v1013_v11 = vpop.eup %1012 }
 0x4e2   :  { %v1015_v12 = vpop.eup %1014  ;;  %v282_v19 = vmul.f32 %v1013_v11, %v1325_v16 }
 0x4e3   :  { %v360_v7 = vpop.xlane.xlu0 %359  ;;  %v344_v9 = vpop.xlane.xlu1 %343  ;;  %v250_v21 = vmul.f32 %v1015_v12, %v1373_v49 }
 0x4e4   :  { %1022 = vrcp.f32 %v360_v7  ;;  %v1017_v18 = vpop.eup %1016 }
 0x4e5   :  { %1024 = vrcp.f32 %v344_v9  ;;  %v492_v25 = vsel %vm491_vm4, %v250_v21, %v266_v13  ;;  %v298_v26 = vmul.f32 %v1017_v18, %v1323_v14 }
 0x4e6   :  { %v1019_v20 = vpop.eup %1018  ;;  %v494_v30 = vsel %vm493_vm5, %v492_v25, %v282_v19 }
 0x4e7   :  { %v392_v15 = vpop.xlane.xlu0 %391  ;;  %v376_v17 = vpop.xlane.xlu1 %375  ;;  %v314_v8 = vmul.f32 %v1019_v20, %v1333_v24  ;;  %v496_v49 = vsel %vm495_vm6, %v494_v30, %v298_v26 }
 0x4e8   :  { %1026 = vrcp.f32 %v392_v15 }
 0x4e9   :  { %1028 = vrcp.f32 %v376_v17  ;;  %v497_v39 = vsel %vm135_vm2, %v496_v49, %v314_v8  ;;  %vm506_vm2 = vcmask 588800  }
 0x4ea   :  { %v1021_v23 = vpop.eup %1020 }
 0x4eb   :  { %v424_v27 = vpop.xlane.xlu0 %423  ;;  %v408_v28 = vpop.xlane.xlu1 %407  ;;  %v330_v32 = vmul.f32 %v1021_v23, %v1341_v33 }
 0x4ec   :  { %1030 = vrcp.f32 %v424_v27 }
 0x4ed   :  { %1032 = vrcp.f32 %v408_v28  ;;  %v499_v45 = vsel %vm498_vm7, %v497_v39, %v330_v32 }
 0x4ee   :  { %v1023_v16 = vpop.eup %1022 }
 0x4ef   :  { %v1025_v34 = vpop.eup %1024  ;;  %v456_v35 = vpop.xlane.xlu0 %455  ;;  %v362_v47 = vmul.f32 %v1023_v16, %v1331_v22 }
 0x4f0   :  { %v440_v36 = vpop.xlane.xlu1 %439  ;;  %v346_v14 = vmul.f32 %v1025_v34, %v1348_v38  ;;  %1034 = vrcp.f32 %v456_v35 }
 0x4f1   :  { %1036 = vrcp.f32 %v440_v36 }
 0x4f2   :  { %v1027_v24 = vpop.eup %1026  ;;  %v501_v48 = vsel %vm500_vm8, %v499_v45, %v346_v14 }
 0x4f3   :  { %v1029_v33 = vpop.eup %1028  ;;  %v488_v50 = vpop.xlane.xlu0 %487  ;;  %v394_v53 = vmul.f32 %v1027_v24, %v1339_v31  ;;  %v503_v54 = vsel %vm502_vm9, %v501_v48, %v362_v47 }
 0x4f4   :  { %v472_v51 = vpop.xlane.xlu1 %471  ;;  %v378_v52 = vmul.f32 %v1029_v33, %v1354_v41  ;;  %1038 = vrcp.f32 %v488_v50 }
 0x4f5   :  { %1040 = vrcp.f32 %v472_v51 }
 0x4f6   :  { %v1031_v38 = vpop.eup %1030  ;;  %v505_v55 = vsel %vm504_vm10, %v503_v54, %v378_v52 }
 0x4f7   :  { %v1033_v56 = vpop.eup %1032  ;;  %v426_v29 = vmul.f32 %v1031_v38, %v1346_v37  ;;  %v507_v57 = vsel %vm506_vm2, %v505_v55, %v394_v53 }
 0x4f8   :  { %v410_v22 = vmul.f32 %v1033_v56, %v1361_v43 }
 0x4fa   :  { %v1035_v58 = vpop.eup %1034  ;;  %v509_v59 = vsel %vm508_vm11, %v507_v57, %v410_v22 }
 0x4fb   :  { %v1037_v60 = vpop.eup %1036  ;;  %v458_v31 = vmul.f32 %v1035_v58, %v1352_v40  ;;  %v511_v61 = vsel %vm510_vm12, %v509_v59, %v426_v29  ;;  %v804_v40 = vlaneseq }
 0x4fc   :  { %v442_v41 = vmul.f32 %v1037_v60, %v1365_v44  ;;  %v1184_v44 = vmov 1983009808  }
 0x4fd   :  { %v802_v5 = vunpack.c.l.s4 %v1184_v44  ;;  %v805_v7 = vshrl.u32 %v804_v40, 7 }
 0x4fe   :  { %v1039_v62 = vpop.eup %1038  ;;  %v513_v63 = vsel %vm512_vm13, %v511_v61, %v442_v41 }
 0x4ff   :  { %v1041_v0 = vpop.eup %1040  ;;  %v490_v1 = vmul.f32 %v1039_v62, %v1359_v42  ;;  %v515_v43 = vsel %vm514_vm14, %v513_v63, %v458_v31  ;;  %v803_v6 = vunpack.c.0.s8 %v802_v5 }
 0x500   :  { %v474_v37 = vmul.f32 %v1041_v0, %v1368_v46 }
 0x501   :  { %v806_v11 = vsub.s32 %v803_v6, %v805_v7 }
 0x502   :  { %v517_v2 = vsel %vm516_vm15, %v515_v43, %v474_v37 }
 0x503   :  { %v519_v3 = vsel %vm518_vm0, %v517_v2, %v490_v1 }
 0x504   :  { %v520_v4 = vpack.c.bf16 %v519_v3, %v519_v3 }
 0x506   :  { %746 = vmatmul.mubr.bf16.vlgmr.msra.gmra.mrb[4].mxu0 %v520_v4  ;;  %787 = vmatmul.mubr.bf16.vlgmr.msra.gmra.mrb[4].mxu1 %v520_v4 }
 0x5d9   :  { %v747_v9 = vpop.f32.mrb[4].mxu0  ;;  %v788_v10 = vpop.f32.mrb[4].mxu1 }
 0x5da   :  { %v749_v12 = vpop.f32.mrb[5].mxu0  ;;  %v790_v42 = vpop.f32.mrb[5].mxu1 }
 0x5db   :  { %v799_v13 = vcombine.low %v747_v9, %v749_v12  ;;  %v800_v15 = vcombine.low %v788_v10, %v790_v42  ;;  %v751_v46 = vpop.f32.mrb[6].mxu0  ;;  %v792_v17 = vpop.f32.mrb[6].mxu1 }
 0x5dc   :  { %v752_v18 = vpop.f32.mrb[7].mxu0  ;;  %v793_v19 = vpop.f32.mrb[7].mxu1 }
 0x5dd   :  { %v807_v20 = vrot.slane %v799_v13, %v806_v11  ;;  %v814_v21 = vrot.slane %v800_v15, %v806_v11 }
 0x5df   :  { %v815_v23 = vcombine.low %v807_v20, %v814_v21 }
 0x5e1   :  { %817 = vst [vmem:[#allocation10] sm:$0xff] %v815_v23 }
 0x5e2   :  { %1141 = shalt.err (!%p1138_p8)
}
 0x5e3   :  { %s1142_s4 = scalar_lea.hbm %s1428_s7, 128 }
 0x5e4   :  { %p1143_p9 = scmp.ne.s32.totalorder %s1428_s7, %s1142_s4  ;;  %p1146_p10 = scmp.lt.u32.totalorder %s1142_s4, %s1428_s7 }
 0x5e6   :  { %p1148_p11 = pnand %p1146_p10, %p1143_p9 }
 0x5e8   :  { %1151 = shalt.err (!%p1148_p11)
}
 0x5e9   :  { %827 = dma.vmem_to_hbm [thread:$0]  %s825_s23, 128, %s1428_s7, [#allocation4]  }
 0x5ea   :  { %1158 = dma.done.wait [#allocation4], 128  }
 0x5eb   :  { %1159 = vsyncadd [#allocation4], 4294967168 }
 0x5ec   :  { %831 = vsyncpa [#allocation3], 1 }
 0x5ed   :  { %832 = vsyncpa [#allocation6], 1 }
 0x5ee   :  { %833 = vsyncpa [#allocation9], 1 }
 0x5ef   :  { %834 = vsyncpa [#allocation4], 1 }

// kernel: tpu_custom_call.1
= control target key start
LH: loop header
LB: loop body
LE: loop exit
PB: predicated region body
PF: predicated region fallthrough
CT: control target
= control target key end

     0   :  { %12 = vsyncpa [#allocation3], 0  ;;  %s1421_s0 = inlined_call_operand.hbm [shape: f32[2,32], index: 0, kind: input, shape index: {}]   ;;  %s1422_s1 = inlined_call_operand.hbm [shape: bf16[32,32], index: 1, kind: input, shape index: {}]   ;;  %s1423_s2 = inlined_call_operand.vmem [shape: f32[1,32], index: 2, kind: input, shape index: {}]   ;;  %s1424_s3 = inlined_call_operand.vmem [shape: f32[1,32], index: 3, kind: input, shape index: {}]   ;;  %s1425_s4 = inlined_call_operand.hbm [shape: f32[1,32], index: 4, kind: input, shape index: {}]   ;;  %s1426_s5 = inlined_call_operand.vmem [shape: bf16[32,128], index: 5, kind: input, shape index: {}]   ;;  %s1427_s6 = inlined_call_operand.hbm [shape: bf16[128,512], index: 6, kind: input, shape index: {}]   ;;  %s1428_s7 = inlined_call_operand.hbm [shape: f32[2,512], index: 7, kind: output, shape index: {}]  }
   0x1   :  { %13 = vsyncpa [#allocation6], 0 }
   0x2   :  { %14 = vsyncpa [#allocation9], 0 }
   0x3   :  { %15 = vsyncpa [#allocation4], 0  ;;  %s1160_s24 = smov [#allocation5]   ;;  %s1042_s28 = scalar_lea.hbm %s1422_s1, 256 }
   0x4   :  { %s31_s25 = sshll.u32 %s1160_s24, 4  ;;  %p1043_p0 = scmp.ne.s32.totalorder %s1422_s1, %s1042_s28  ;;  %s32_s25 = int_to_ptr.vmem [resolvable:$true] %s31_s25 }
   0x5   :  { %p1046_p1 = scmp.lt.u32.totalorder %s1042_s28, %s1422_s1 }
   0x7   :  { %p1048_p2 = pnand %p1046_p1, %p1043_p0 }
   0x9   :  { %1051 = shalt.err (!%p1048_p2)
}
   0xa   :  { %s1052_s10 = scalar_lea.vmem %s32_s25, 256  ;;  %p1057_p4 = scmp.lt.s32.totalorder %s32_s25, %s32_s25 }
   0xb   :  { %p1053_p3 = scmp.ne.s32.totalorder %s32_s25, %s1052_s10  ;;  %p1058_p5 = scmp.lt.s32.totalorder %s1052_s10, %s1052_s10 }
   0xd   :  { %p1059_p6 = por %p1058_p5, %p1057_p4 }
   0xf   :  { %p1060_p7 = pnand %p1059_p6, %p1053_p3 }
  0x11   :  { %1063 = shalt.err (!%p1060_p7)
}
  0x12   :  { %s1161_s11 = smov 64   ;;  %s1162_s12 = smov 4  }
  0x13   :  { %37 = dma.hbm_to_vmem [thread:$0]  %s1422_s1, 256, %s32_s25, [#allocation6], %s1161_s11, %s1161_s11, %s1162_s12  }
  0x14   :  { %s1163_s15 = smov [#allocation2]   ;;  %s1164_s17 = smov [#allocation7]  }
  0x15   :  { %s22_s16 = sshll.u32 %s1163_s15, 4  ;;  %s48_s18 = sshll.u32 %s1164_s17, 4  ;;  %s23_s16 = int_to_ptr.vmem [resolvable:$true] %s22_s16  ;;  %s49_s18 = int_to_ptr.vmem [resolvable:$true] %s48_s18 }
  0x16   :  { %s1064_s21 = scalar_lea.hbm %s1421_s0, 32 }
  0x17   :  { %p1065_p8 = scmp.ne.s32.totalorder %s1421_s0, %s1064_s21  ;;  %p1068_p9 = scmp.lt.u32.totalorder %s1064_s21, %s1421_s0 }
  0x19   :  { %p1070_p10 = pnand %p1068_p9, %p1065_p8 }
  0x1b   :  { %1073 = shalt.err (!%p1070_p10)
}
  0x1c   :  { %s1074_s1 = scalar_lea.vmem %s23_s16, 32  ;;  %p1079_p12 = scmp.lt.s32.totalorder %s23_s16, %s23_s16 }
  0x1d   :  { %p1075_p11 = scmp.ne.s32.totalorder %s23_s16, %s1074_s1  ;;  %p1080_p13 = scmp.lt.s32.totalorder %s1074_s1, %s1074_s1 }
  0x1f   :  { %p1081_p0 = por %p1080_p13, %p1079_p12 }
  0x21   :  { %p1082_p1 = pnand %p1081_p0, %p1075_p11 }
  0x23   :  { %1085 = shalt.err (!%p1082_p1)
}
  0x24   :  { %25 = dma.hbm_to_vmem [thread:$0]  %s1421_s0, 32, %s23_s16, [#allocation3]  }
  0x25   :  { %s1086_s30 = scalar_lea.hbm %s1425_s4, 16 }
  0x26   :  { %p1087_p2 = scmp.ne.s32.totalorder %s1425_s4, %s1086_s30  ;;  %p1090_p3 = scmp.lt.u32.totalorder %s1086_s30, %s1425_s4 }
  0x28   :  { %p1092_p4 = pnand %p1090_p3, %p1087_p2 }
  0x2a   :  { %1095 = shalt.err (!%p1092_p4)
}
  0x2b   :  { %s1096_s13 = scalar_lea.vmem %s49_s18, 16  ;;  %s1100_s14 = scalar_lea.vmem %s49_s18, 32 }
  0x2c   :  { %p1097_p5 = scmp.ne.s32.totalorder %s49_s18, %s1096_s13  ;;  %p1101_p6 = scmp.lt.s32.totalorder %s49_s18, %s49_s18 }
  0x2d   :  { %p1102_p7 = scmp.lt.s32.totalorder %s1100_s14, %s1096_s13 }
  0x2f   :  { %p1103_p8 = por %p1102_p7, %p1101_p6 }
  0x31   :  { %p1104_p9 = pnand %p1103_p8, %p1097_p5 }
  0x33   :  { %1107 = shalt.err (!%p1104_p9)
}
  0x34   :  { %51 = dma.hbm_to_vmem [thread:$0]  %s1425_s4, 16, %s49_s18, [#allocation6]  }
  0x35   :  { %s1165_s16 = smov [#allocation8]   ;;  %s1108_s21 = scalar_lea.hbm %s1427_s6, 4096 }
  0x36   :  { %s59_s17 = sshll.u32 %s1165_s16, 4  ;;  %p1109_p10 = scmp.ne.s32.totalorder %s1427_s6, %s1108_s21  ;;  %s60_s17 = int_to_ptr.vmem [resolvable:$true] %s59_s17 }
  0x37   :  { %p1112_p11 = scmp.lt.u32.totalorder %s1108_s21, %s1427_s6 }
  0x39   :  { %p1114_p12 = pnand %p1112_p11, %p1109_p10 }
  0x3b   :  { %1117 = shalt.err (!%p1114_p12)
}
  0x3c   :  { %s1118_s1 = scalar_lea.vmem %s60_s17, 4096  ;;  %p1123_p0 = scmp.lt.s32.totalorder %s60_s17, %s60_s17 }
  0x3d   :  { %p1119_p13 = scmp.ne.s32.totalorder %s60_s17, %s1118_s1  ;;  %p1124_p1 = scmp.lt.s32.totalorder %s1118_s1, %s1118_s1 }
  0x3f   :  { %p1125_p2 = por %p1124_p1, %p1123_p0 }
  0x41   :  { %p1126_p3 = pnand %p1125_p2, %p1119_p13 }
  0x43   :  { %1129 = shalt.err (!%p1126_p3)
}
  0x44   :  { %s1166_s4 = smov 256   ;;  %s1167_s18 = smov 16  }
  0x45   :  { %65 = dma.hbm_to_vmem [thread:$0]  %s1427_s6, 4096, %s60_s17, [#allocation9], %s1166_s4, %s1166_s4, %s1167_s18  }
  0x46   :  { %1152 = dma.done.wait [#allocation3], 32  }
  0x47   :  { %1153 = vsyncadd [#allocation3], 4294967264 }
  0x48   :  { %1154 = dma.done.wait [#allocation6], 272  }
  0x49   :  { %1155 = vsyncadd [#allocation6], 4294967024 }
  0x4a   :  { %1156 = dma.done.wait [#allocation9], 4096  }
  0x4b   :  { %1157 = vsyncadd [#allocation9], 4294963200  ;;  %vm80_vm0 = vcmask 254976   ;;  %v79_v0 = vld [vmem:[#allocation2] sm:$0x3]  ;;  %v924_v7 = vld [vmem:[#allocation5] sm:$0xff]  }
  0x4c   :  { %v81_v1 = vsel %vm80_vm0, %v79_v0, 0.0  ;;  %v1168_v8 = vmov 0.0   ;;  %vm1169_vm1 = vmmov 0   ;;  %v925_v9 = vld [vmem:[#allocation5 + $0x8] sm:$0xff]   ;;  %v836_v17 = vld [vmem:[#allocation7] ss:$0 sm:$0xff] }
  0x4d   :  { %82 = vadd.xlane.f32.xlu0 %v81_v1  ;;  %882 = vmatprep.subr.bf16.mxu0 %v1168_v8  ;;  %v926_v10 = vld [vmem:[%s1426_s5] sm:$0xff]   ;;  %vm135_vm2 = vcmask 261120   ;;  %v927_v21 = vld [vmem:[%s1426_s5 + $0x8] sm:$0xff]   ;;  %vm283_vm3 = vcmask 255168   ;;  %vm251_vm4 = vcmask 123968   ;;  %vm315_vm5 = vcmask 386368  }
  0x4e   :  { %886 = vmatprep.mubr.msk.bf16.mxu0 %vm1169_vm1, %v1168_v8  ;;  %883 = vmatpush3.bf16.msra.mxu0 %v924_v7  ;;  %v835_v15 = vld [vmem:[%s1424_s3] ss:$0 sm:$0xff]  ;;  %vm267_vm6 = vcmask 189568   ;;  %vm347_vm7 = vcmask 517568   ;;  %vm299_vm8 = vcmask 320768   ;;  %vm379_vm9 = vcmask 648768  }
  0x4f   :  { %890 = vmatprep.subr.bf16.mxu1 %v1168_v8  ;;  %884 = vmatprep.subr.bf16.mxu0 %v1168_v8  ;;  %v837_v22 = vld [vmem:[%s1423_s2] ss:$0 sm:$0xff]  ;;  %vm331_vm10 = vcmask 451968   ;;  %vm411_vm11 = vcmask 779968   ;;  %vm363_vm12 = vcmask 583168   ;;  %vm443_vm13 = vcmask 911168  }
  0x50   :  { %894 = vmatprep.mubr.msk.bf16.mxu1 %vm1169_vm1, %v1168_v8  ;;  %891 = vmatpush3.bf16.msra.mxu1 %v926_v10  ;;  %vm395_vm14 = vcmask 714368   ;;  %vm475_vm15 = vcmask 1042368   ;;  %vm459_vm1 = vcmask 976768   ;;  %s1170_s2 = smov 120   ;;  %s1171_s3 = smov 112  }
  0x51   :  { %892 = vmatprep.subr.bf16.mxu1 %v1168_v8  ;;  %s1172_s5 = smov 104   ;;  %s1173_s13 = smov 72  }
  0x52   :  { %885 = vmatpush3.bf16.msra.mxu0 %v925_v9  ;;  %s1174_s14 = smov 96   ;;  %s1175_s0 = smov 56  }
  0x53   :  { %s1176_s15 = smov 88   ;;  %s1177_s16 = smov 40  }
  0x54   :  { %893 = vmatpush3.bf16.msra.mxu1 %v927_v21  ;;  %s1178_s17 = smov 80   ;;  %s1179_s19 = smov 24  }
  0x55   :  { %s1180_s20 = smov 8   ;;  %s1181_s21 = smov 48  }
  0x56   :  { %s1182_s22 = smov 32  }
  0xda   :  { %v83_v2 = vpop.xlane.xlu0 %82 }
  0xdb   :  { %v85_v3 = vmul.f32 0.03125, %v83_v2 }
  0xdd   :  { %v86_v4 = vsub.f32 %v79_v0, %v85_v3 }
  0xdf   :  { %v87_v5 = vmul.f32 %v86_v4, %v86_v4 }
  0xe1   :  { %v88_v6 = vsel %vm80_vm0, %v87_v5, 0.0  ;;  %vm427_vm0 = vcmask 845568  }
  0xe2   :  { %89 = vadd.xlane.f32.xlu0 %v88_v6 }
 0x16f   :  { %v90_v11 = vpop.xlane.xlu0 %89 }
 0x170   :  { %v91_v12 = vmul.f32 0.03125, %v90_v11 }
 0x172   :  { %v92_v13 = vadd.f32 1e-05, %v91_v12 }
 0x174   :  { %976 = vrsqrt.f32 %v92_v13 }
 0x17e   :  { %v977_v14 = vpop.eup %976 }
 0x17f   :  { %v94_v16 = vmul.f32 %v977_v14, %v86_v4 }
 0x181   :  { %v102_v18 = vmul.f32 %v835_v15, %v94_v16 }
 0x183   :  { %v110_v19 = vadd.f32 %v836_v17, %v102_v18 }
 0x185   :  { %v111_v20 = vpack.c.bf16 %v110_v19, %v110_v19 }
 0x187   :  { %887 = vmatmul.mubr.msk.bf16.vlgmr.msra.gmra.mrb[0].mxu0 %vm135_vm2, %v111_v20 }
 0x25a   :  { %v173_v23 = vpop.f32.mrb[0].mxu0 }
 0x25b   :  { %v174_v24 = vadd.f32 %v837_v22, %v173_v23  ;;  %v888_v25 = vpop.f32.mrb[1].mxu0 }
 0x25c   :  { %v176_v26 = vpop.f32.mrb[2].mxu0 }
 0x25d   :  { %v179_v27 = vpack.c.bf16 %v174_v24, %v174_v24  ;;  %v889_v28 = vpop.f32.mrb[3].mxu0 }
 0x25f   :  { %895 = vmatmul.mubr.msk.bf16.vlgmr.msra.gmra.mrb[0].mxu1 %vm135_vm2, %v179_v27 }
 0x332   :  { %v1291_v29 = vpop.f32.mrb[0].mxu1 }
 0x333   :  { %v896_v30 = vpop.f32.mrb[1].mxu1  ;;  %v284_v31 = vsel %vm283_vm3, %v1291_v29, -inf  ;;  %v252_v32 = vsel %vm251_vm4, %v1291_v29, -inf  ;;  %v316_v35 = vsel %vm315_vm5, %v1291_v29, -inf  ;;  %v268_v36 = vsel %vm267_vm6, %v1291_v29, -inf }
 0x334   :  { %285 = vmax.xlane.f32.xlu0 %v284_v31  ;;  %253 = vmax.xlane.f32.xlu1 %v252_v32  ;;  %v236_v33 = vpop.f32.mrb[2].mxu1  ;;  %v348_v37 = vsel %vm347_vm7, %v1291_v29, -inf  ;;  %v300_v38 = vsel %vm299_vm8, %v1291_v29, -inf  ;;  %v380_v39 = vsel %vm379_vm9, %v1291_v29, -inf  ;;  %v332_v40 = vsel %vm331_vm10, %v1291_v29, -inf }
 0x335   :  { %v897_v34 = vpop.f32.mrb[3].mxu1  ;;  %v412_v41 = vsel %vm411_vm11, %v1291_v29, -inf  ;;  %v364_v42 = vsel %vm363_vm12, %v1291_v29, -inf  ;;  %v444_v43 = vsel %vm443_vm13, %v1291_v29, -inf  ;;  %v396_v44 = vsel %vm395_vm14, %v1291_v29, -inf }
 0x336   :  { %v476_v45 = vsel %vm475_vm15, %v1291_v29, -inf  ;;  %v428_v46 = vsel %vm427_vm0, %v1291_v29, -inf  ;;  %v460_v47 = vsel %vm459_vm1, %v1291_v29, -inf  ;;  %vm239_vm3 = vcmask 58368  }
 0x337   :  { %v240_v48 = vsel %vm239_vm3, %v1291_v29, -inf  ;;  %vm491_vm4 = vcmask 64512   ;;  %vm493_vm5 = vcmask 130048   ;;  %vm495_vm6 = vcmask 195584  }
 0x338   :  { %317 = vmax.xlane.f32.xlu0 %v316_v35  ;;  %269 = vmax.xlane.f32.xlu1 %v268_v36  ;;  %vm498_vm7 = vcmask 326656   ;;  %vm500_vm8 = vcmask 392192   ;;  %vm502_vm9 = vcmask 457728   ;;  %vm504_vm10 = vcmask 523264  }
 0x339   :  { %vm508_vm11 = vcmask 654336   ;;  %vm510_vm12 = vcmask 719872   ;;  %vm512_vm13 = vcmask 785408   ;;  %vm514_vm14 = vcmask 850944  }
 0x33a   :  { %vm516_vm15 = vcmask 916480   ;;  %vm518_vm0 = vcmask 982016  }
 0x33c   :  { %349 = vmax.xlane.f32.xlu0 %v348_v37  ;;  %301 = vmax.xlane.f32.xlu1 %v300_v38 }
 0x340   :  { %381 = vmax.xlane.f32.xlu0 %v380_v39  ;;  %333 = vmax.xlane.f32.xlu1 %v332_v40 }
 0x344   :  { %413 = vmax.xlane.f32.xlu0 %v412_v41  ;;  %365 = vmax.xlane.f32.xlu1 %v364_v42 }
 0x348   :  { %445 = vmax.xlane.f32.xlu0 %v444_v43  ;;  %397 = vmax.xlane.f32.xlu1 %v396_v44 }
 0x34c   :  { %477 = vmax.xlane.f32.xlu0 %v476_v45  ;;  %429 = vmax.xlane.f32.xlu1 %v428_v46 }
 0x350   :  { %461 = vmax.xlane.f32.xlu1 %v460_v47 }
 0x354   :  { %241 = vmax.xlane.f32.xlu1 %v240_v48 }
 0x3c1   :  { %v286_v49 = vpop.xlane.xlu0 %285  ;;  %v254_v50 = vpop.xlane.xlu1 %253 }
 0x3c2   :  { %v287_v51 = vsub.f32 %v1291_v29, %v286_v49  ;;  %v255_v52 = vsub.f32 %v1291_v29, %v254_v50 }
 0x3c4   :  { %v256_v53 = vmul.f32 1.442695, %v255_v52  ;;  %v288_v56 = vmul.f32 1.442695, %v287_v51 }
 0x3c5   :  { %v318_v54 = vpop.xlane.xlu0 %317  ;;  %v270_v55 = vpop.xlane.xlu1 %269 }
 0x3c6   :  { %v271_v57 = vsub.f32 %v1291_v29, %v270_v55  ;;  %978 = vpow2.f32 %v256_v53  ;;  %v319_v63 = vsub.f32 %v1291_v29, %v318_v54 }
 0x3c7   :  { %980 = vpow2.f32 %v288_v56 }
 0x3c8   :  { %v272_v58 = vmul.f32 1.442695, %v271_v57  ;;  %v320_v5 = vmul.f32 1.442695, %v319_v63 }
 0x3c9   :  { %v350_v59 = vpop.xlane.xlu0 %349  ;;  %v302_v60 = vpop.xlane.xlu1 %301 }
 0x3ca   :  { %v351_v61 = vsub.f32 %v1291_v29, %v350_v59  ;;  %v303_v62 = vsub.f32 %v1291_v29, %v302_v60  ;;  %982 = vpow2.f32 %v272_v58 }
 0x3cc   :  { %v352_v0 = vmul.f32 1.442695, %v351_v61  ;;  %v304_v1 = vmul.f32 1.442695, %v303_v62 }
 0x3cd   :  { %v382_v2 = vpop.xlane.xlu0 %381  ;;  %v334_v3 = vpop.xlane.xlu1 %333 }
 0x3ce   :  { %984 = vpow2.f32 %v352_v0  ;;  %v383_v4 = vsub.f32 %v1291_v29, %v382_v2  ;;  %v335_v6 = vsub.f32 %v1291_v29, %v334_v3 }
 0x3cf   :  { %986 = vpow2.f32 %v304_v1 }
 0x3d0   :  { %v384_v7 = vmul.f32 1.442695, %v383_v4  ;;  %v1318_v8 = vpop.eup %978  ;;  %v336_v12 = vmul.f32 1.442695, %v335_v6 }
 0x3d1   :  { %v414_v9 = vpop.xlane.xlu0 %413  ;;  %v366_v10 = vpop.xlane.xlu1 %365  ;;  %259 = vrot.lane.b32.xlu1 %v1318_v8, %s1170_s2 }
 0x3d2   :  { %988 = vpow2.f32 %v384_v7  ;;  %v415_v11 = vsub.f32 %v1291_v29, %v414_v9  ;;  %v367_v13 = vsub.f32 %v1291_v29, %v366_v10  ;;  %v1323_v14 = vpop.eup %980 }
 0x3d3   :  { %990 = vpow2.f32 %v320_v5 }
 0x3d4   :  { %v416_v15 = vmul.f32 1.442695, %v415_v11  ;;  %v1325_v16 = vpop.eup %982  ;;  %v368_v20 = vmul.f32 1.442695, %v367_v13 }
 0x3d5   :  { %v446_v17 = vpop.xlane.xlu0 %445  ;;  %v398_v18 = vpop.xlane.xlu1 %397  ;;  %275 = vrot.lane.b32.xlu0 %v1325_v16, %s1171_s3  ;;  %291 = vrot.lane.b32.xlu1 %v1323_v14, %s1172_s5 }
 0x3d6   :  { %992 = vpow2.f32 %v416_v15  ;;  %v447_v19 = vsub.f32 %v1291_v29, %v446_v17  ;;  %v399_v21 = vsub.f32 %v1291_v29, %v398_v18 }
 0x3d7   :  { %994 = vpow2.f32 %v336_v12 }
 0x3d8   :  { %v1331_v22 = vpop.eup %984  ;;  %v448_v23 = vmul.f32 1.442695, %v447_v19  ;;  %v400_v28 = vmul.f32 1.442695, %v399_v21  ;;  %v930_v19 = vld [vmem:[#allocation8 + $0x4] ss:$16 sps:$4 sm:$0xff]  }
 0x3d9   :  { %v1333_v24 = vpop.eup %986  ;;  %v478_v25 = vpop.xlane.xlu0 %477  ;;  %355 = vrot.lane.b32.xlu0 %v1331_v22, %s1173_s13  ;;  %v928_v21 = vld [vmem:[#allocation8] ss:$16 sps:$4 sm:$0xff]   ;;  %713 = vmatprep.subr.bf16.mxu0 %v930_v19 }
 0x3da   :  { %v430_v26 = vpop.xlane.xlu1 %429  ;;  %996 = vpow2.f32 %v448_v23  ;;  %v479_v27 = vsub.f32 %v1291_v29, %v478_v25  ;;  %307 = vrot.lane.b32.xlu1 %v1333_v24, %s1174_s14  ;;  %v931_v23 = vld [vmem:[#allocation8 + $0x8] ss:$16 sps:$4 sm:$0xff]   ;;  %714 = vmatpush1.bf16.msra.mxu0 %v928_v21  ;;  %v936_v25 = vld [vmem:[#allocation8 + $0x24] ss:$16 sps:$4 sm:$0xff]  }
 0x3db   :  { %998 = vpow2.f32 %v368_v20  ;;  %v431_v30 = vsub.f32 %v1291_v29, %v430_v26  ;;  %v933_v20 = vld [vmem:[#allocation8 + $0xc] ss:$16 sps:$4 sm:$0xff]   ;;  %715 = vmatprep.subr.bf16.mxu0 %v936_v25 }
 0x3dc   :  { %v1339_v31 = vpop.eup %988  ;;  %v480_v32 = vmul.f32 1.442695, %v479_v27  ;;  %754 = vmatprep.subr.bf16.mxu1 %v933_v20  ;;  %v939_v26 = vld [vmem:[#allocation8 + $0x2c] ss:$16 sps:$4 sm:$0xff]   ;;  %v934_v27 = vld [vmem:[#allocation8 + $0x20] ss:$16 sps:$4 sm:$0xff]  }
 0x3dd   :  { %v1341_v33 = vpop.eup %990  ;;  %387 = vrot.lane.b32.xlu0 %v1339_v31, %s1175_s0  ;;  %v432_v35 = vmul.f32 1.442695, %v431_v30  ;;  %755 = vmatpush1.bf16.msra.mxu1 %v931_v23  ;;  %v942_v30 = vld [vmem:[#allocation8 + $0x44] ss:$16 sps:$4 sm:$0xff]  }
 0x3de   :  { %v462_v34 = vpop.xlane.xlu1 %461  ;;  %1000 = vpow2.f32 %v480_v32  ;;  %323 = vrot.lane.b32.xlu1 %v1341_v33, %s1176_s15  ;;  %756 = vmatprep.subr.bf16.mxu1 %v939_v26  ;;  %v945_v32 = vld [vmem:[#allocation8 + $0x4c] ss:$16 sps:$4 sm:$0xff]  }
 0x3df   :  { %1002 = vpow2.f32 %v400_v28  ;;  %v463_v36 = vsub.f32 %v1291_v29, %v462_v34  ;;  %v937_v28 = vld [vmem:[#allocation8 + $0x28] ss:$16 sps:$4 sm:$0xff]   ;;  %716 = vmatpush1.bf16.msra.mxu0 %v934_v27  ;;  %v940_v34 = vld [vmem:[#allocation8 + $0x40] ss:$16 sps:$4 sm:$0xff]  }
 0x3e0   :  { %v1346_v37 = vpop.eup %992  ;;  %1004 = vpow2.f32 %v432_v35  ;;  %v943_v35 = vld [vmem:[#allocation8 + $0x48] ss:$16 sps:$4 sm:$0xff]   ;;  %717 = vmatprep.subr.bf16.mxu0 %v942_v30 }
 0x3e1   :  { %v1348_v38 = vpop.eup %994  ;;  %419 = vrot.lane.b32.xlu0 %v1346_v37, %s1177_s16  ;;  %v464_v39 = vmul.f32 1.442695, %v463_v36  ;;  %757 = vmatpush1.bf16.msra.mxu1 %v937_v28  ;;  %v948_v36 = vld [vmem:[#allocation8 + $0x64] ss:$16 sps:$4 sm:$0xff]  }
 0x3e2   :  { %339 = vrot.lane.b32.xlu1 %v1348_v38, %s1178_s17  ;;  %v242_v45 = vpop.xlane.xlu1 %241  ;;  %758 = vmatprep.subr.bf16.mxu1 %v945_v32 }
 0x3e3   :  { %1006 = vpow2.f32 %v464_v39  ;;  %v243_v47 = vsub.f32 %v1291_v29, %v242_v45  ;;  %718 = vmatpush1.bf16.msra.mxu0 %v940_v34  ;;  %v951_v39 = vld [vmem:[#allocation8 + $0x6c] ss:$16 sps:$4 sm:$0xff]   ;;  %v946_v45 = vld [vmem:[#allocation8 + $0x60] ss:$16 sps:$4 sm:$0xff]  }
 0x3e4   :  { %v1352_v40 = vpop.eup %996  ;;  %719 = vmatprep.subr.bf16.mxu0 %v948_v36 }
 0x3e5   :  { %v1354_v41 = vpop.eup %998  ;;  %451 = vrot.lane.b32.xlu0 %v1352_v40, %s1179_s19  ;;  %v244_v48 = vmul.f32 1.442695, %v243_v47  ;;  %759 = vmatpush1.bf16.msra.mxu1 %v943_v35  ;;  %v949_v47 = vld [vmem:[#allocation8 + $0x68] ss:$16 sps:$4 sm:$0xff]  }
 0x3e6   :  { %371 = vrot.lane.b32.xlu1 %v1354_v41, %s1161_s11  ;;  %760 = vmatprep.subr.bf16.mxu1 %v951_v39  ;;  %s1185_s11 = smov [#allocation10]  }
 0x3e7   :  { %1008 = vpow2.f32 %v244_v48  ;;  %720 = vmatpush1.bf16.msra.mxu0 %v946_v45  ;;  %v954_v48 = vld [vmem:[#allocation8 + $0x84] ss:$16 sps:$4 sm:$0xff]   ;;  %s824_s23 = sshll.u32 %s1185_s11, 4  ;;  %s825_s23 = int_to_ptr.vmem [resolvable:$true] %s824_s23 }
 0x3e8   :  { %v1359_v42 = vpop.eup %1000  ;;  %721 = vmatprep.subr.bf16.mxu0 %v954_v48  ;;  %s1130_s24 = scalar_lea.vmem %s825_s23, 128  ;;  %p1135_p5 = scmp.lt.s32.totalorder %s825_s23, %s825_s23 }
 0x3e9   :  { %v1361_v43 = vpop.eup %1002  ;;  %483 = vrot.lane.b32.xlu0 %v1359_v42, %s1180_s20  ;;  %761 = vmatpush1.bf16.msra.mxu1 %v949_v47  ;;  %p1131_p4 = scmp.ne.s32.totalorder %s825_s23, %s1130_s24  ;;  %p1136_p6 = scmp.lt.s32.totalorder %s1130_s24, %s1130_s24 }
 0x3ea   :  { %403 = vrot.lane.b32.xlu1 %v1361_v43, %s1181_s21  ;;  %v1365_v44 = vpop.eup %1004 }
 0x3eb   :  { %p1137_p7 = por %p1136_p6, %p1135_p5 }
 0x3ed   :  { %v1368_v46 = vpop.eup %1006  ;;  %p1138_p8 = pnand %p1137_p7, %p1131_p4 }
 0x3ee   :  { %435 = vrot.lane.b32.xlu1 %v1365_v44, %s1182_s22 }
 0x3f1   :  { %v1373_v49 = vpop.eup %1008 }
 0x3f2   :  { %467 = vrot.lane.b32.xlu1 %v1368_v46, %s1167_s18  ;;  %v246_v50 = vsel %vm239_vm3, %v1373_v49, 0.0 }
 0x408   :  { %247 = vadd.xlane.f32.xlu0 %v246_v50  ;;  %v957_v50 = vld [vmem:[#allocation8 + $0x8c] ss:$16 sps:$4 sm:$0xff]  }
 0x409   :  { %762 = vmatprep.subr.bf16.mxu1 %v957_v50 }
 0x443   :  { %v260_v51 = vpop.permute.xlu1 %259 }
 0x444   :  { %v262_v52 = vsel %vm239_vm3, %v260_v51, 0.0  ;;  %v952_v51 = vld [vmem:[#allocation8 + $0x80] ss:$16 sps:$4 sm:$0xff]  }
 0x445   :  { %263 = vadd.xlane.f32.xlu0 %v262_v52  ;;  %v955_v52 = vld [vmem:[#allocation8 + $0x88] ss:$16 sps:$4 sm:$0xff]   ;;  %722 = vmatpush1.bf16.msra.mxu0 %v952_v51 }
 0x446   :  { %763 = vmatpush1.bf16.msra.mxu1 %v955_v52 }
 0x447   :  { %v276_v53 = vpop.permute.xlu0 %275  ;;  %v292_v54 = vpop.permute.xlu1 %291 }
 0x448   :  { %v278_v55 = vsel %vm239_vm3, %v276_v53, 0.0  ;;  %v294_v56 = vsel %vm239_vm3, %v292_v54, 0.0  ;;  %v960_v53 = vld [vmem:[#allocation8 + $0xa4] ss:$16 sps:$4 sm:$0xff]   ;;  %v963_v54 = vld [vmem:[#allocation8 + $0xac] ss:$16 sps:$4 sm:$0xff]  }
 0x449   :  { %279 = vadd.xlane.f32.xlu1 %v278_v55  ;;  %295 = vadd.xlane.f32.xlu0 %v294_v56  ;;  %v958_v55 = vld [vmem:[#allocation8 + $0xa0] ss:$16 sps:$4 sm:$0xff]   ;;  %v961_v56 = vld [vmem:[#allocation8 + $0xa8] ss:$16 sps:$4 sm:$0xff]  }
 0x44a   :  { %723 = vmatprep.subr.bf16.mxu0 %v960_v53  ;;  %764 = vmatprep.subr.bf16.mxu1 %v963_v54 }
 0x44b   :  { %v356_v29 = vpop.permute.xlu0 %355  ;;  %724 = vmatpush1.bf16.msra.mxu0 %v958_v55  ;;  %765 = vmatpush1.bf16.msra.mxu1 %v961_v56 }
 0x44c   :  { %v308_v57 = vpop.permute.xlu1 %307  ;;  %v358_v63 = vsel %vm239_vm3, %v356_v29, 0.0  ;;  %v966_v29 = vld [vmem:[#allocation8 + $0xc4] ss:$16 sps:$4 sm:$0xff]  }
 0x44d   :  { %v310_v58 = vsel %vm239_vm3, %v308_v57, 0.0  ;;  %v969_v57 = vld [vmem:[#allocation8 + $0xcc] ss:$16 sps:$4 sm:$0xff]   ;;  %725 = vmatprep.subr.bf16.mxu0 %v966_v29 }
 0x44e   :  { %311 = vadd.xlane.f32.xlu0 %v310_v58  ;;  %v964_v58 = vld [vmem:[#allocation8 + $0xc0] ss:$16 sps:$4 sm:$0xff]   ;;  %766 = vmatprep.subr.bf16.mxu1 %v969_v57 }
 0x44f   :  { %v388_v59 = vpop.permute.xlu0 %387  ;;  %726 = vmatpush1.bf16.msra.mxu0 %v964_v58 }
 0x450   :  { %v324_v60 = vpop.permute.xlu1 %323  ;;  %v390_v3 = vsel %vm239_vm3, %v388_v59, 0.0  ;;  %v967_v59 = vld [vmem:[#allocation8 + $0xc8] ss:$16 sps:$4 sm:$0xff]  }
 0x451   :  { %v326_v61 = vsel %vm239_vm3, %v324_v60, 0.0  ;;  %767 = vmatpush1.bf16.msra.mxu1 %v967_v59  ;;  %v970_v60 = vld [vmem:[#allocation8 + $0xe0] ss:$16 sps:$4 sm:$0xff]  }
 0x452   :  { %327 = vadd.xlane.f32.xlu0 %v326_v61  ;;  %v972_v61 = vld [vmem:[#allocation8 + $0xe4] ss:$16 sps:$4 sm:$0xff]  }
 0x453   :  { %v420_v1 = vpop.permute.xlu0 %419  ;;  %727 = vmatprep.subr.bf16.mxu0 %v972_v61 }
 0x454   :  { %v340_v62 = vpop.permute.xlu1 %339  ;;  %v422_v7 = vsel %vm239_vm3, %v420_v1, 0.0  ;;  %728 = vmatpush1.bf16.msra.mxu0 %v970_v60 }
 0x455   :  { %v342_v0 = vsel %vm239_vm3, %v340_v62, 0.0  ;;  %v973_v62 = vld [vmem:[#allocation8 + $0xe8] ss:$16 sps:$4 sm:$0xff]  }
 0x456   :  { %359 = vadd.xlane.f32.xlu0 %v358_v63  ;;  %343 = vadd.xlane.f32.xlu1 %v342_v0  ;;  %v975_v63 = vld [vmem:[#allocation8 + $0xec] ss:$16 sps:$4 sm:$0xff]   ;;  %v1183_v0 = vmov 0  }
 0x457   :  { %v452_v5 = vpop.permute.xlu0 %451  ;;  %745 = vmatprep.mubr.bf16.mxu0 %v1183_v0  ;;  %768 = vmatprep.subr.bf16.mxu1 %v975_v63 }
 0x458   :  { %v372_v2 = vpop.permute.xlu1 %371  ;;  %v454_v11 = vsel %vm239_vm3, %v452_v5, 0.0  ;;  %786 = vmatprep.mubr.bf16.mxu1 %v1183_v0  ;;  %769 = vmatpush1.bf16.msra.mxu1 %v973_v62 }
 0x459   :  { %v374_v4 = vsel %vm239_vm3, %v372_v2, 0.0 }
 0x45a   :  { %391 = vadd.xlane.f32.xlu0 %v390_v3  ;;  %375 = vadd.xlane.f32.xlu1 %v374_v4 }
 0x45b   :  { %v484_v13 = vpop.permute.xlu0 %483 }
 0x45c   :  { %v404_v6 = vpop.permute.xlu1 %403  ;;  %v486_v17 = vsel %vm239_vm3, %v484_v13, 0.0 }
 0x45d   :  { %v406_v9 = vsel %vm239_vm3, %v404_v6, 0.0 }
 0x45e   :  { %423 = vadd.xlane.f32.xlu0 %v422_v7  ;;  %407 = vadd.xlane.f32.xlu1 %v406_v9 }
 0x460   :  { %v436_v10 = vpop.permute.xlu1 %435 }
 0x461   :  { %v438_v12 = vsel %vm239_vm3, %v436_v10, 0.0 }
 0x462   :  { %455 = vadd.xlane.f32.xlu0 %v454_v11  ;;  %439 = vadd.xlane.f32.xlu1 %v438_v12 }
 0x464   :  { %v468_v15 = vpop.permute.xlu1 %467 }
 0x465   :  { %v470_v18 = vsel %vm239_vm3, %v468_v15, 0.0 }
 0x466   :  { %487 = vadd.xlane.f32.xlu0 %v486_v17  ;;  %471 = vadd.xlane.f32.xlu1 %v470_v18 }
 0x495   :  { %v248_v1 = vpop.xlane.xlu0 %247 }
 0x4d2   :  { %v264_v2 = vpop.xlane.xlu0 %263 }
 0x4d3   :  { %1010 = vrcp.f32 %v264_v2 }
 0x4d6   :  { %v296_v3 = vpop.xlane.xlu0 %295  ;;  %v280_v4 = vpop.xlane.xlu1 %279 }
 0x4d7   :  { %1012 = vrcp.f32 %v280_v4 }
 0x4d8   :  { %1014 = vrcp.f32 %v248_v1 }
 0x4d9   :  { %1016 = vrcp.f32 %v296_v3 }
 0x4db   :  { %v312_v5 = vpop.xlane.xlu0 %311 }
 0x4dc   :  { %1018 = vrcp.f32 %v312_v5 }
 0x4dd   :  { %v1011_v10 = vpop.eup %1010 }
 0x4de   :  { %v266_v13 = vmul.f32 %v1011_v10, %v1318_v8 }
 0x4df   :  { %v328_v6 = vpop.xlane.xlu0 %327 }
 0x4e0   :  { %1020 = vrcp.f32 %v328_v6 }
 0x4e1   :  { %v1013_v11 = vpop.eup %1012 }
 0x4e2   :  { %v1015_v12 = vpop.eup %1014  ;;  %v282_v19 = vmul.f32 %v1013_v11, %v1325_v16 }
 0x4e3   :  { %v360_v7 = vpop.xlane.xlu0 %359  ;;  %v344_v9 = vpop.xlane.xlu1 %343  ;;  %v250_v21 = vmul.f32 %v1015_v12, %v1373_v49 }
 0x4e4   :  { %1022 = vrcp.f32 %v360_v7  ;;  %v1017_v18 = vpop.eup %1016 }
 0x4e5   :  { %1024 = vrcp.f32 %v344_v9  ;;  %v492_v25 = vsel %vm491_vm4, %v250_v21, %v266_v13  ;;  %v298_v26 = vmul.f32 %v1017_v18, %v1323_v14 }
 0x4e6   :  { %v1019_v20 = vpop.eup %1018  ;;  %v494_v30 = vsel %vm493_vm5, %v492_v25, %v282_v19 }
 0x4e7   :  { %v392_v15 = vpop.xlane.xlu0 %391  ;;  %v376_v17 = vpop.xlane.xlu1 %375  ;;  %v314_v8 = vmul.f32 %v1019_v20, %v1333_v24  ;;  %v496_v49 = vsel %vm495_vm6, %v494_v30, %v298_v26 }
 0x4e8   :  { %1026 = vrcp.f32 %v392_v15 }
 0x4e9   :  { %1028 = vrcp.f32 %v376_v17  ;;  %v497_v39 = vsel %vm135_vm2, %v496_v49, %v314_v8  ;;  %vm506_vm2 = vcmask 588800  }
 0x4ea   :  { %v1021_v23 = vpop.eup %1020 }
 0x4eb   :  { %v424_v27 = vpop.xlane.xlu0 %423  ;;  %v408_v28 = vpop.xlane.xlu1 %407  ;;  %v330_v32 = vmul.f32 %v1021_v23, %v1341_v33 }
 0x4ec   :  { %1030 = vrcp.f32 %v424_v27 }
 0x4ed   :  { %1032 = vrcp.f32 %v408_v28  ;;  %v499_v45 = vsel %vm498_vm7, %v497_v39, %v330_v32 }
 0x4ee   :  { %v1023_v16 = vpop.eup %1022 }
 0x4ef   :  { %v1025_v34 = vpop.eup %1024  ;;  %v456_v35 = vpop.xlane.xlu0 %455  ;;  %v362_v47 = vmul.f32 %v1023_v16, %v1331_v22 }
 0x4f0   :  { %v440_v36 = vpop.xlane.xlu1 %439  ;;  %v346_v14 = vmul.f32 %v1025_v34, %v1348_v38  ;;  %1034 = vrcp.f32 %v456_v35 }
 0x4f1   :  { %1036 = vrcp.f32 %v440_v36 }
 0x4f2   :  { %v1027_v24 = vpop.eup %1026  ;;  %v501_v48 = vsel %vm500_vm8, %v499_v45, %v346_v14 }
 0x4f3   :  { %v1029_v33 = vpop.eup %1028  ;;  %v488_v50 = vpop.xlane.xlu0 %487  ;;  %v394_v53 = vmul.f32 %v1027_v24, %v1339_v31  ;;  %v503_v54 = vsel %vm502_vm9, %v501_v48, %v362_v47 }
 0x4f4   :  { %v472_v51 = vpop.xlane.xlu1 %471  ;;  %v378_v52 = vmul.f32 %v1029_v33, %v1354_v41  ;;  %1038 = vrcp.f32 %v488_v50 }
 0x4f5   :  { %1040 = vrcp.f32 %v472_v51 }
 0x4f6   :  { %v1031_v38 = vpop.eup %1030  ;;  %v505_v55 = vsel %vm504_vm10, %v503_v54, %v378_v52 }
 0x4f7   :  { %v1033_v56 = vpop.eup %1032  ;;  %v426_v29 = vmul.f32 %v1031_v38, %v1346_v37  ;;  %v507_v57 = vsel %vm506_vm2, %v505_v55, %v394_v53 }
 0x4f8   :  { %v410_v22 = vmul.f32 %v1033_v56, %v1361_v43 }
 0x4fa   :  { %v1035_v58 = vpop.eup %1034  ;;  %v509_v59 = vsel %vm508_vm11, %v507_v57, %v410_v22 }
 0x4fb   :  { %v1037_v60 = vpop.eup %1036  ;;  %v458_v31 = vmul.f32 %v1035_v58, %v1352_v40  ;;  %v511_v61 = vsel %vm510_vm12, %v509_v59, %v426_v29  ;;  %v804_v40 = vlaneseq }
 0x4fc   :  { %v442_v41 = vmul.f32 %v1037_v60, %v1365_v44  ;;  %v1184_v44 = vmov 1983009808  }
 0x4fd   :  { %v802_v5 = vunpack.c.l.s4 %v1184_v44  ;;  %v805_v7 = vshrl.u32 %v804_v40, 7 }
 0x4fe   :  { %v1039_v62 = vpop.eup %1038  ;;  %v513_v63 = vsel %vm512_vm13, %v511_v61, %v442_v41 }
 0x4ff   :  { %v1041_v0 = vpop.eup %1040  ;;  %v490_v1 = vmul.f32 %v1039_v62, %v1359_v42  ;;  %v515_v43 = vsel %vm514_vm14, %v513_v63, %v458_v31  ;;  %v803_v6 = vunpack.c.0.s8 %v802_v5 }
 0x500   :  { %v474_v37 = vmul.f32 %v1041_v0, %v1368_v46 }
 0x501   :  { %v806_v11 = vsub.s32 %v803_v6, %v805_v7 }
 0x502   :  { %v517_v2 = vsel %vm516_vm15, %v515_v43, %v474_v37 }
 0x503   :  { %v519_v3 = vsel %vm518_vm0, %v517_v2, %v490_v1 }
 0x504   :  { %v520_v4 = vpack.c.bf16 %v519_v3, %v519_v3 }
 0x506   :  { %746 = vmatmul.mubr.bf16.vlgmr.msra.gmra.mrb[4].mxu0 %v520_v4  ;;  %787 = vmatmul.mubr.bf16.vlgmr.msra.gmra.mrb[4].mxu1 %v520_v4 }
 0x5d9   :  { %v747_v9 = vpop.f32.mrb[4].mxu0  ;;  %v788_v10 = vpop.f32.mrb[4].mxu1 }
 0x5da   :  { %v749_v12 = vpop.f32.mrb[5].mxu0  ;;  %v790_v42 = vpop.f32.mrb[5].mxu1 }
 0x5db   :  { %v799_v13 = vcombine.low %v747_v9, %v749_v12  ;;  %v800_v15 = vcombine.low %v788_v10, %v790_v42  ;;  %v751_v46 = vpop.f32.mrb[6].mxu0  ;;  %v792_v17 = vpop.f32.mrb[6].mxu1 }
 0x5dc   :  { %v752_v18 = vpop.f32.mrb[7].mxu0  ;;  %v793_v19 = vpop.f32.mrb[7].mxu1 }
 0x5dd   :  { %v807_v20 = vrot.slane %v799_v13, %v806_v11  ;;  %v814_v21 = vrot.slane %v800_v15, %v806_v11 }
 0x5df   :  { %v815_v23 = vcombine.low %v807_v20, %v814_v21 }
 0x5e1   :  { %817 = vst [vmem:[#allocation10] sm:$0xff] %v815_v23 }
 0x5e2   :  { %1141 = shalt.err (!%p1138_p8)
}
 0x5e3   :  { %s1142_s4 = scalar_lea.hbm %s1428_s7, 128 }
 0x5e4   :  { %p1143_p9 = scmp.ne.s32.totalorder %s1428_s7, %s1142_s4  ;;  %p1146_p10 = scmp.lt.u32.totalorder %s1142_s4, %s1428_s7 }
 0x5e6   :  { %p1148_p11 = pnand %p1146_p10, %p1143_p9 }
 0x5e8   :  { %1151 = shalt.err (!%p1148_p11)
}
 0x5e9   :  { %827 = dma.vmem_to_hbm [thread:$0]  %s825_s23, 128, %s1428_s7, [#allocation4]  }
 0x5ea   :  { %1158 = dma.done.wait [#allocation4], 128  }
 0x5eb   :  { %1159 = vsyncadd [#allocation4], 4294967168 }
 0x5ec   :  { %831 = vsyncpa [#allocation3], 1 }
 0x5ed   :  { %832 = vsyncpa [#allocation6], 1 }
 0x5ee   :  { %833 = vsyncpa [#allocation9], 1 }
 0x5ef   :  { %834 = vsyncpa [#allocation4], 1 }

</bundles_post_ra>
